<compile_context>
chip_gen: v7x
topology: tpu7x:2x2x1
jax: 0.10.0
libtpu: 0.0.40
codegen_flags: <defaults>
</compile_context>

<pallas_src>
import functools

import jax
import jax.numpy as jnp
import numpy as np
from jax.experimental import pallas as pl
from jax.experimental.pallas import tpu as pltpu

BN_EPS = 1e-5
LANE = 128


# ---------------------------------------------------------------------------
# Fused Pallas kernel: all layers, register-resident activations
# ---------------------------------------------------------------------------
def _postnet_fused_kernel(x_ref, w_ref, b_ref, o_ref, *, K, L, pad, Cpad):
    # x_ref: (Bblk, T, Cpad)        channel-padded input block (lane-dense)
    # w_ref: (L, K*Cpad, Cpad)      BN-folded, channel-padded im2col weights (bf16)
    # b_ref: (L, 1, Cpad)           BN-folded, channel-padded biases (f32)
    # o_ref: (Bblk, T, Cpad)        lane-dense output (wrapper slices :mel_dim)
    Bblk, T, _ = x_ref.shape

    h = x_ref[...].astype(jnp.float32)                       # (Bblk, T, Cpad)
    # Zero halo rows, hoisted out of the layer loop (built once, in-register).
    zhalo = jnp.zeros((Bblk, pad, Cpad), jnp.float32)

    for layer in range(L):                                   # static unroll
        h_pad = jnp.concatenate([zhalo, h, zhalo], axis=1)   # (Bblk, T+2p, Cpad)
        # im2col: K shifted views concatenated along lanes -> (Bblk, T, K*Cpad)
        im2col = jnp.concatenate(
            [h_pad[:, k:k + T, :] for k in range(K)], axis=-1)
        # Fold batch into the matmul M dim; bf16 MXU operands, f32 accumulate.
        lhs = im2col.reshape(Bblk * T, K * Cpad).astype(jnp.bfloat16)
        acc = jnp.dot(lhs, w_ref[layer],
                      preferred_element_type=jnp.float32)    # (Bblk*T, Cpad)
        acc = acc + b_ref[layer]                             # bias (1, Cpad)
        if layer < L - 1:
            acc = jnp.tanh(acc)                              # no tanh on last
            # Dropout(0.5): identity in eval mode.
        h = acc.reshape(Bblk, T, Cpad)

    o_ref[...] = h.astype(o_ref.dtype)                       # one lane-dense store


def kokoro_postnet_pallas(x, w_stack, b_stack, *, kernel_size, mel_dim):
    """x: (B, T, mel_dim) -> (B, T, mel_dim). Eval-mode KokoroPostnet."""
    B, T, Cin = x.shape
    L, KC, Cpad = w_stack.shape
    K = kernel_size
    assert KC == K * Cpad and Cin <= Cpad
    pad = (K - 1) // 2

    # Batch blocking: fold several batch elements into the matmul M dim, but
    # keep >= 2 grid steps (both v7x TensorCores busy) and cap per-step rows
    # to bound register pressure.
    max_rows_per_step = 64
    bblk_cap = max(1, max_rows_per_step // T)
    num_blocks = max(2 if B > 1 else 1, pl.cdiv(B, bblk_cap))
    Bblk = pl.cdiv(B, num_blocks)
    Bpad = num_blocks * Bblk

    # Pre-pad channels to lane-dense Cpad (and batch to Bpad) so every
    # in-kernel load/store is full-lane and no in-kernel zeroing is needed.
    x_p = jnp.pad(x, ((0, Bpad - B), (0, 0), (0, Cpad - Cin)))

    kernel = functools.partial(_postnet_fused_kernel,
                               K=K, L=L, pad=pad, Cpad=Cpad)

    out = pl.pallas_call(
        kernel,
        out_shape=jax.ShapeDtypeStruct((Bpad, T, Cpad), x.dtype),
        grid_spec=pltpu.PrefetchScalarGridSpec(
            num_scalar_prefetch=0,
            grid=(num_blocks,),
            in_specs=[
                pl.BlockSpec((Bblk, T, Cpad), lambda g: (g, 0, 0)),
                # Constant index_maps: weights/biases stay VMEM-resident.
                pl.BlockSpec((L, K * Cpad, Cpad), lambda g: (0, 0, 0)),
                pl.BlockSpec((L, 1, Cpad), lambda g: (0, 0, 0)),
            ],
            out_specs=pl.BlockSpec((Bblk, T, Cpad), lambda g: (g, 0, 0)),
        ),
        compiler_params=pltpu.CompilerParams(
            dimension_semantics=("parallel",)),
    )(x_p, w_stack, b_stack)

    # TODO(synk): this slice is a wrapper-side HBM copy; skip it if the
    # consumer can read the lane-dense (..., 128) buffer directly.
    return out[:B, :, :mel_dim]


# ---------------------------------------------------------------------------
# Parameter construction (deterministic) + BN folding + channel padding
# ---------------------------------------------------------------------------
def init_postnet_params(key, mel_dim, hidden_dim, num_layers, kernel_size):
    """Raw per-layer params mimicking the PyTorch module:
       (conv_w [Cout,Cin,K], conv_b [Cout], gamma, beta, run_mean, run_var)."""
    dims = [mel_dim] + [hidden_dim] * (num_layers - 1) + [mel_dim]
    params = []
    for i in range(num_layers):
        cin, cout = dims[i], dims[i + 1]
        key, k1, k2, k3, k4, k5, k6 = jax.random.split(key, 7)
        bound = 1.0 / np.sqrt(cin * kernel_size)
        w = jax.random.uniform(k1, (cout, cin, kernel_size), jnp.float32,
                               -bound, bound)
        b = jax.random.uniform(k2, (cout,), jnp.float32, -bound, bound)
        gamma = 1.0 + 0.1 * jax.random.normal(k3, (cout,), jnp.float32)
        beta = 0.1 * jax.random.normal(k4, (cout,), jnp.float32)
        run_mean = 0.1 * jax.random.normal(k5, (cout,), jnp.float32)
        run_var = jnp.abs(1.0 + 0.1 * jax.random.normal(k6, (cout,),
                                                        jnp.float32))
        params.append((w, b, gamma, beta, run_mean, run_var))
    return params


def fold_and_pack(params, kernel_size):
    """Fold eval-mode BatchNorm1d into conv weight/bias, zero-pad channel dims
       to a lane-dense Cpad, and pack as stacked im2col weights/biases:
         w_stack: (L, K*Cpad, Cpad) bf16   row index = k*Cpad + cin
         b_stack: (L, 1, Cpad)       f32
    """
    max_c = max(max(w.shape[0], w.shape[1]) for (w, *_rest) in params)
    Cpad = ((max_c + LANE - 1) // LANE) * LANE
    K = kernel_size

    ws, bs = [], []
    for (w, b, gamma, beta, mean, var) in params:
        cout, cin, _ = w.shape
        scale = gamma / jnp.sqrt(var + BN_EPS)                  # (Cout,)
        w_eff = w * scale[:, None, None]                        # (Cout,Cin,K)
        b_eff = (b - mean) * scale + beta                       # (Cout,)

        w_pad = jnp.zeros((Cpad, Cpad, K), jnp.float32)
        w_pad = w_pad.at[:cout, :cin, :].set(w_eff)
        b_pad = jnp.zeros((Cpad,), jnp.float32).at[:cout].set(b_eff)

        # (Cpad_out, Cpad_in, K) -> (K, Cpad_in, Cpad_out) -> (K*Cpad, Cpad)
        w_klc = jnp.transpose(w_pad, (2, 1, 0)).reshape(K * Cpad, Cpad)
        ws.append(w_klc)
        bs.append(b_pad.reshape(1, Cpad))

    # MXU operands in bf16 (f32 accumulation in-kernel); bias stays f32.
    # NOTE: contraction dim is kept padded to 128 lanes (lane-dense loads);
    # for production channel counts revisit the narrower-contraction layout.
    return jnp.stack(ws).astype(jnp.bfloat16), jnp.stack(bs), Cpad


# ---------------------------------------------------------------------------
# Pure-JAX reference (mimics the PyTorch module exactly, eval mode)
# ---------------------------------------------------------------------------
def kokoro_postnet_ref(x, params, kernel_size):
    pad = (kernel_size - 1) // 2
    h = jnp.transpose(x, (0, 2, 1))  # (B, C, T)  -- PyTorch NCL
    n = len(params)
    for i, (w, b, gamma, beta, mean, var) in enumerate(params):
        h = jax.lax.conv_general_dilated(
            h, w, window_strides=(1,), padding=[(pad, pad)],
            dimension_numbers=("NCH", "OIH", "NCH"))
        h = h + b[None, :, None]
        h = (gamma[None, :, None] * (h - mean[None, :, None])
             / jnp.sqrt(var[None, :, None] + BN_EPS) + beta[None, :, None])
        if i < n - 1:
            h = jnp.tanh(h)
        # Dropout: identity in eval mode
    return jnp.transpose(h, (0, 2, 1))


# ---------------------------------------------------------------------------
if __name__ == "__main__":
    # Small shapes consistent with the module's forward:
    # x: (batch, mel_seq_len, mel_dim).  B=4 exercises batch->M blocking.
    B, T = 4, 16
    MEL_DIM, HIDDEN_DIM, NUM_LAYERS, KERNEL_SIZE = 16, 32, 5, 5

    key = jax.random.PRNGKey(0)
    key, kx = jax.random.split(key)
    x = jax.random.normal(kx, (B, T, MEL_DIM), jnp.float32)

    params = init_postnet_params(key, MEL_DIM, HIDDEN_DIM, NUM_LAYERS,
                                 KERNEL_SIZE)
    w_stack, b_stack, _cpad = fold_and_pack(params, KERNEL_SIZE)

    out = kokoro_postnet_pallas(x, w_stack, b_stack,
                                kernel_size=KERNEL_SIZE, mel_dim=MEL_DIM)
    out = jax.block_until_ready(out)

    ref = jax.block_until_ready(kokoro_postnet_ref(x, params, KERNEL_SIZE))
    # Tolerance loosened vs. the f32 version: MXU operands are bf16
    # (accumulation stays f32), so operand rounding exceeds 1e-4.
    np.testing.assert_allclose(np.asarray(out), np.asarray(ref),
                               rtol=5e-2, atol=5e-2)
    assert out.shape == (B, T, MEL_DIM)

    print("KERNEL_OK")
</pallas_src>

<mosaic_0001>
module attributes {stable_mosaic.version = 11 : i64} {
  func.func @_postnet_fused_kernel(%arg0: i32, %arg1: memref<2x16x128xf32, #tpu.memory_space<vmem>>, %arg2: memref<5x640x128xbf16, #tpu.memory_space<vmem>>, %arg3: memref<5x1x128xf32, #tpu.memory_space<vmem>>, %arg4: memref<2x16x128xf32, #tpu.memory_space<vmem>>) attributes {dimension_semantics = [#tpu.dimension_semantics<parallel>], iteration_bounds = array<i64: 2>, scalar_prefetch = 0 : i64, scratch_operands = 0 : i64, tpu.core_type = #tpu.core_type<tc>, window_params = [{transform_indices = @transform_0, window_bounds = array<i64: 2, 16, 128>}, {pipeline_mode = #tpu.pipeline_mode<synchronous>, transform_indices = @transform_1, window_bounds = array<i64: 5, 640, 128>}, {pipeline_mode = #tpu.pipeline_mode<synchronous>, transform_indices = @transform_2, window_bounds = array<i64: 5, 1, 128>}, {transform_indices = @transform_3, window_bounds = array<i64: 2, 16, 128>}]} {
    %c0 = arith.constant 0 : index
    %c0_0 = arith.constant 0 : index
    %c0_1 = arith.constant 0 : index
    %0 = vector.load %arg1[%c0, %c0_0, %c0_1] : memref<2x16x128xf32, #tpu.memory_space<vmem>>, vector<2x16x128xf32>
    %cst = arith.constant 0.000000e+00 : f32
    %1 = vector.broadcast %cst : f32 to vector<2x2x128xf32>
    %2 = tpu.concatenate %1, %0, %1 in 1 : vector<2x2x128xf32>, vector<2x16x128xf32>, vector<2x2x128xf32> -> vector<2x20x128xf32>
    %3 = vector.extract_strided_slice %2 {offsets = [0, 0, 0], sizes = [2, 16, 128], strides = [1, 1, 1]} : vector<2x20x128xf32> to vector<2x16x128xf32>
    %4 = vector.extract_strided_slice %2 {offsets = [0, 1, 0], sizes = [2, 16, 128], strides = [1, 1, 1]} : vector<2x20x128xf32> to vector<2x16x128xf32>
    %5 = vector.extract_strided_slice %2 {offsets = [0, 2, 0], sizes = [2, 16, 128], strides = [1, 1, 1]} : vector<2x20x128xf32> to vector<2x16x128xf32>
    %6 = vector.extract_strided_slice %2 {offsets = [0, 3, 0], sizes = [2, 16, 128], strides = [1, 1, 1]} : vector<2x20x128xf32> to vector<2x16x128xf32>
    %7 = vector.extract_strided_slice %2 {offsets = [0, 4, 0], sizes = [2, 16, 128], strides = [1, 1, 1]} : vector<2x20x128xf32> to vector<2x16x128xf32>
    %8 = tpu.concatenate %3, %4, %5, %6, %7 in 2 : vector<2x16x128xf32>, vector<2x16x128xf32>, vector<2x16x128xf32>, vector<2x16x128xf32>, vector<2x16x128xf32> -> vector<2x16x640xf32>
    %9 = vector.shape_cast %8 : vector<2x16x640xf32> to vector<32x640xf32>
    %10 = arith.truncf %9 : vector<32x640xf32> to vector<32x640xbf16>
    %c0_2 = arith.constant 0 : index
    %c0_3 = arith.constant 0 : index
    %c0_4 = arith.constant 0 : index
    %11 = vector.load %arg2[%c0_2, %c0_3, %c0_4] : memref<5x640x128xbf16, #tpu.memory_space<vmem>>, vector<1x640x128xbf16>
    %12 = vector.shape_cast %11 : vector<1x640x128xbf16> to vector<640x128xbf16>
    %cst_5 = arith.constant dense<0.000000e+00> : vector<32x128xf32>
    %13 = tpu.matmul %10, %12, %cst_5 {dimension_numbers = #tpu.dot_dimension_numbers<[1], [0], [0], [1], [0, 0, 1, 1], [], []>} : vector<32x640xbf16>, vector<640x128xbf16>, vector<32x128xf32> -> vector<32x128xf32>
    %c0_6 = arith.constant 0 : index
    %c0_7 = arith.constant 0 : index
    %c0_8 = arith.constant 0 : index
    %14 = vector.load %arg3[%c0_6, %c0_7, %c0_8] : memref<5x1x128xf32, #tpu.memory_space<vmem>>, vector<1x1x128xf32>
    %15 = vector.shape_cast %14 : vector<1x1x128xf32> to vector<1x128xf32>
    %16 = vector.broadcast %15 : vector<1x128xf32> to vector<32x128xf32>
    %17 = arith.addf %13, %16 : vector<32x128xf32>
    %18 = math.tanh %17 : vector<32x128xf32>
    %19 = vector.shape_cast %18 : vector<32x128xf32> to vector<2x16x128xf32>
    %20 = tpu.concatenate %1, %19, %1 in 1 : vector<2x2x128xf32>, vector<2x16x128xf32>, vector<2x2x128xf32> -> vector<2x20x128xf32>
    %21 = vector.extract_strided_slice %20 {offsets = [0, 0, 0], sizes = [2, 16, 128], strides = [1, 1, 1]} : vector<2x20x128xf32> to vector<2x16x128xf32>
    %22 = vector.extract_strided_slice %20 {offsets = [0, 1, 0], sizes = [2, 16, 128], strides = [1, 1, 1]} : vector<2x20x128xf32> to vector<2x16x128xf32>
    %23 = vector.extract_strided_slice %20 {offsets = [0, 2, 0], sizes = [2, 16, 128], strides = [1, 1, 1]} : vector<2x20x128xf32> to vector<2x16x128xf32>
    %24 = vector.extract_strided_slice %20 {offsets = [0, 3, 0], sizes = [2, 16, 128], strides = [1, 1, 1]} : vector<2x20x128xf32> to vector<2x16x128xf32>
    %25 = vector.extract_strided_slice %20 {offsets = [0, 4, 0], sizes = [2, 16, 128], strides = [1, 1, 1]} : vector<2x20x128xf32> to vector<2x16x128xf32>
    %26 = tpu.concatenate %21, %22, %23, %24, %25 in 2 : vector<2x16x128xf32>, vector<2x16x128xf32>, vector<2x16x128xf32>, vector<2x16x128xf32>, vector<2x16x128xf32> -> vector<2x16x640xf32>
    %27 = vector.shape_cast %26 : vector<2x16x640xf32> to vector<32x640xf32>
    %28 = arith.truncf %27 : vector<32x640xf32> to vector<32x640xbf16>
    %c1 = arith.constant 1 : index
    %c0_9 = arith.constant 0 : index
    %c0_10 = arith.constant 0 : index
    %29 = vector.load %arg2[%c1, %c0_9, %c0_10] : memref<5x640x128xbf16, #tpu.memory_space<vmem>>, vector<1x640x128xbf16>
    %30 = vector.shape_cast %29 : vector<1x640x128xbf16> to vector<640x128xbf16>
    %cst_11 = arith.constant dense<0.000000e+00> : vector<32x128xf32>
    %31 = tpu.matmul %28, %30, %cst_11 {dimension_numbers = #tpu.dot_dimension_numbers<[1], [0], [0], [1], [0, 0, 1, 1], [], []>} : vector<32x640xbf16>, vector<640x128xbf16>, vector<32x128xf32> -> vector<32x128xf32>
    %c1_12 = arith.constant 1 : index
    %c0_13 = arith.constant 0 : index
    %c0_14 = arith.constant 0 : index
    %32 = vector.load %arg3[%c1_12, %c0_13, %c0_14] : memref<5x1x128xf32, #tpu.memory_space<vmem>>, vector<1x1x128xf32>
    %33 = vector.shape_cast %32 : vector<1x1x128xf32> to vector<1x128xf32>
    %34 = vector.broadcast %33 : vector<1x128xf32> to vector<32x128xf32>
    %35 = arith.addf %31, %34 : vector<32x128xf32>
    %36 = math.tanh %35 : vector<32x128xf32>
    %37 = vector.shape_cast %36 : vector<32x128xf32> to vector<2x16x128xf32>
    %38 = tpu.concatenate %1, %37, %1 in 1 : vector<2x2x128xf32>, vector<2x16x128xf32>, vector<2x2x128xf32> -> vector<2x20x128xf32>
    %39 = vector.extract_strided_slice %38 {offsets = [0, 0, 0], sizes = [2, 16, 128], strides = [1, 1, 1]} : vector<2x20x128xf32> to vector<2x16x128xf32>
    %40 = vector.extract_strided_slice %38 {offsets = [0, 1, 0], sizes = [2, 16, 128], strides = [1, 1, 1]} : vector<2x20x128xf32> to vector<2x16x128xf32>
    %41 = vector.extract_strided_slice %38 {offsets = [0, 2, 0], sizes = [2, 16, 128], strides = [1, 1, 1]} : vector<2x20x128xf32> to vector<2x16x128xf32>
    %42 = vector.extract_strided_slice %38 {offsets = [0, 3, 0], sizes = [2, 16, 128], strides = [1, 1, 1]} : vector<2x20x128xf32> to vector<2x16x128xf32>
    %43 = vector.extract_strided_slice %38 {offsets = [0, 4, 0], sizes = [2, 16, 128], strides = [1, 1, 1]} : vector<2x20x128xf32> to vector<2x16x128xf32>
    %44 = tpu.concatenate %39, %40, %41, %42, %43 in 2 : vector<2x16x128xf32>, vector<2x16x128xf32>, vector<2x16x128xf32>, vector<2x16x128xf32>, vector<2x16x128xf32> -> vector<2x16x640xf32>
    %45 = vector.shape_cast %44 : vector<2x16x640xf32> to vector<32x640xf32>
    %46 = arith.truncf %45 : vector<32x640xf32> to vector<32x640xbf16>
    %c2 = arith.constant 2 : index
    %c0_15 = arith.constant 0 : index
    %c0_16 = arith.constant 0 : index
    %47 = vector.load %arg2[%c2, %c0_15, %c0_16] : memref<5x640x128xbf16, #tpu.memory_space<vmem>>, vector<1x640x128xbf16>
    %48 = vector.shape_cast %47 : vector<1x640x128xbf16> to vector<640x128xbf16>
    %cst_17 = arith.constant dense<0.000000e+00> : vector<32x128xf32>
    %49 = tpu.matmul %46, %48, %cst_17 {dimension_numbers = #tpu.dot_dimension_numbers<[1], [0], [0], [1], [0, 0, 1, 1], [], []>} : vector<32x640xbf16>, vector<640x128xbf16>, vector<32x128xf32> -> vector<32x128xf32>
    %c2_18 = arith.constant 2 : index
    %c0_19 = arith.constant 0 : index
    %c0_20 = arith.constant 0 : index
    %50 = vector.load %arg3[%c2_18, %c0_19, %c0_20] : memref<5x1x128xf32, #tpu.memory_space<vmem>>, vector<1x1x128xf32>
    %51 = vector.shape_cast %50 : vector<1x1x128xf32> to vector<1x128xf32>
    %52 = vector.broadcast %51 : vector<1x128xf32> to vector<32x128xf32>
    %53 = arith.addf %49, %52 : vector<32x128xf32>
    %54 = math.tanh %53 : vector<32x128xf32>
    %55 = vector.shape_cast %54 : vector<32x128xf32> to vector<2x16x128xf32>
    %56 = tpu.concatenate %1, %55, %1 in 1 : vector<2x2x128xf32>, vector<2x16x128xf32>, vector<2x2x128xf32> -> vector<2x20x128xf32>
    %57 = vector.extract_strided_slice %56 {offsets = [0, 0, 0], sizes = [2, 16, 128], strides = [1, 1, 1]} : vector<2x20x128xf32> to vector<2x16x128xf32>
    %58 = vector.extract_strided_slice %56 {offsets = [0, 1, 0], sizes = [2, 16, 128], strides = [1, 1, 1]} : vector<2x20x128xf32> to vector<2x16x128xf32>
    %59 = vector.extract_strided_slice %56 {offsets = [0, 2, 0], sizes = [2, 16, 128], strides = [1, 1, 1]} : vector<2x20x128xf32> to vector<2x16x128xf32>
    %60 = vector.extract_strided_slice %56 {offsets = [0, 3, 0], sizes = [2, 16, 128], strides = [1, 1, 1]} : vector<2x20x128xf32> to vector<2x16x128xf32>
    %61 = vector.extract_strided_slice %56 {offsets = [0, 4, 0], sizes = [2, 16, 128], strides = [1, 1, 1]} : vector<2x20x128xf32> to vector<2x16x128xf32>
    %62 = tpu.concatenate %57, %58, %59, %60, %61 in 2 : vector<2x16x128xf32>, vector<2x16x128xf32>, vector<2x16x128xf32>, vector<2x16x128xf32>, vector<2x16x128xf32> -> vector<2x16x640xf32>
    %63 = vector.shape_cast %62 : vector<2x16x640xf32> to vector<32x640xf32>
    %64 = arith.truncf %63 : vector<32x640xf32> to vector<32x640xbf16>
    %c3 = arith.constant 3 : index
    %c0_21 = arith.constant 0 : index
    %c0_22 = arith.constant 0 : index
    %65 = vector.load %arg2[%c3, %c0_21, %c0_22] : memref<5x640x128xbf16, #tpu.memory_space<vmem>>, vector<1x640x128xbf16>
    %66 = vector.shape_cast %65 : vector<1x640x128xbf16> to vector<640x128xbf16>
    %cst_23 = arith.constant dense<0.000000e+00> : vector<32x128xf32>
    %67 = tpu.matmul %64, %66, %cst_23 {dimension_numbers = #tpu.dot_dimension_numbers<[1], [0], [0], [1], [0, 0, 1, 1], [], []>} : vector<32x640xbf16>, vector<640x128xbf16>, vector<32x128xf32> -> vector<32x128xf32>
    %c3_24 = arith.constant 3 : index
    %c0_25 = arith.constant 0 : index
    %c0_26 = arith.constant 0 : index
    %68 = vector.load %arg3[%c3_24, %c0_25, %c0_26] : memref<5x1x128xf32, #tpu.memory_space<vmem>>, vector<1x1x128xf32>
    %69 = vector.shape_cast %68 : vector<1x1x128xf32> to vector<1x128xf32>
    %70 = vector.broadcast %69 : vector<1x128xf32> to vector<32x128xf32>
    %71 = arith.addf %67, %70 : vector<32x128xf32>
    %72 = math.tanh %71 : vector<32x128xf32>
    %73 = vector.shape_cast %72 : vector<32x128xf32> to vector<2x16x128xf32>
    %74 = tpu.concatenate %1, %73, %1 in 1 : vector<2x2x128xf32>, vector<2x16x128xf32>, vector<2x2x128xf32> -> vector<2x20x128xf32>
    %75 = vector.extract_strided_slice %74 {offsets = [0, 0, 0], sizes = [2, 16, 128], strides = [1, 1, 1]} : vector<2x20x128xf32> to vector<2x16x128xf32>
    %76 = vector.extract_strided_slice %74 {offsets = [0, 1, 0], sizes = [2, 16, 128], strides = [1, 1, 1]} : vector<2x20x128xf32> to vector<2x16x128xf32>
    %77 = vector.extract_strided_slice %74 {offsets = [0, 2, 0], sizes = [2, 16, 128], strides = [1, 1, 1]} : vector<2x20x128xf32> to vector<2x16x128xf32>
    %78 = vector.extract_strided_slice %74 {offsets = [0, 3, 0], sizes = [2, 16, 128], strides = [1, 1, 1]} : vector<2x20x128xf32> to vector<2x16x128xf32>
    %79 = vector.extract_strided_slice %74 {offsets = [0, 4, 0], sizes = [2, 16, 128], strides = [1, 1, 1]} : vector<2x20x128xf32> to vector<2x16x128xf32>
    %80 = tpu.concatenate %75, %76, %77, %78, %79 in 2 : vector<2x16x128xf32>, vector<2x16x128xf32>, vector<2x16x128xf32>, vector<2x16x128xf32>, vector<2x16x128xf32> -> vector<2x16x640xf32>
    %81 = vector.shape_cast %80 : vector<2x16x640xf32> to vector<32x640xf32>
    %82 = arith.truncf %81 : vector<32x640xf32> to vector<32x640xbf16>
    %c4 = arith.constant 4 : index
    %c0_27 = arith.constant 0 : index
    %c0_28 = arith.constant 0 : index
    %83 = vector.load %arg2[%c4, %c0_27, %c0_28] : memref<5x640x128xbf16, #tpu.memory_space<vmem>>, vector<1x640x128xbf16>
    %84 = vector.shape_cast %83 : vector<1x640x128xbf16> to vector<640x128xbf16>
    %cst_29 = arith.constant dense<0.000000e+00> : vector<32x128xf32>
    %85 = tpu.matmul %82, %84, %cst_29 {dimension_numbers = #tpu.dot_dimension_numbers<[1], [0], [0], [1], [0, 0, 1, 1], [], []>} : vector<32x640xbf16>, vector<640x128xbf16>, vector<32x128xf32> -> vector<32x128xf32>
    %c4_30 = arith.constant 4 : index
    %c0_31 = arith.constant 0 : index
    %c0_32 = arith.constant 0 : index
    %86 = vector.load %arg3[%c4_30, %c0_31, %c0_32] : memref<5x1x128xf32, #tpu.memory_space<vmem>>, vector<1x1x128xf32>
    %87 = vector.shape_cast %86 : vector<1x1x128xf32> to vector<1x128xf32>
    %88 = vector.broadcast %87 : vector<1x128xf32> to vector<32x128xf32>
    %89 = arith.addf %85, %88 : vector<32x128xf32>
    %90 = vector.shape_cast %89 : vector<32x128xf32> to vector<2x16x128xf32>
    %c0_33 = arith.constant 0 : index
    %c0_34 = arith.constant 0 : index
    %c0_35 = arith.constant 0 : index
    %91 = vector.load %arg4[%c0_33, %c0_34, %c0_35] : memref<2x16x128xf32, #tpu.memory_space<vmem>>, vector<2x16x128xf32>
    tpu.vector_store %arg4[%c0_33, %c0_34, %c0_35], %90 {strides = array<i32>} : memref<2x16x128xf32, #tpu.memory_space<vmem>>, vector<2x16x128xf32>,
    return
  }
  func.func @transform_0(%arg0: i32) -> (i32, i32, i32) {
    %c0_i32 = arith.constant 0 : i32
    %c0_i32_0 = arith.constant 0 : i32
    %c0_i32_1 = arith.constant 0 : i32
    return %arg0, %c0_i32, %c0_i32_0 : i32, i32, i32
  }
  func.func @transform_1(%arg0: i32) -> (i32, i32, i32) {
    %c0_i32 = arith.constant 0 : i32
    %c0_i32_0 = arith.constant 0 : i32
    %c0_i32_1 = arith.constant 0 : i32
    %c0_i32_2 = arith.constant 0 : i32
    return %c0_i32, %c0_i32_0, %c0_i32_1 : i32, i32, i32
  }
  func.func @transform_2(%arg0: i32) -> (i32, i32, i32) {
    %c0_i32 = arith.constant 0 : i32
    %c0_i32_0 = arith.constant 0 : i32
    %c0_i32_1 = arith.constant 0 : i32
    %c0_i32_2 = arith.constant 0 : i32
    return %c0_i32, %c0_i32_0, %c0_i32_1 : i32, i32, i32
  }
  func.func @transform_3(%arg0: i32) -> (i32, i32, i32) {
    %c0_i32 = arith.constant 0 : i32
    %c0_i32_0 = arith.constant 0 : i32
    %c0_i32_1 = arith.constant 0 : i32
    return %arg0, %c0_i32, %c0_i32_0 : i32, i32, i32
  }
}

</mosaic_0001>

<bundles_post_ra>
// kernel: tpu_custom_call.1
= control target key start
LH: loop header
LB: loop body
LE: loop exit
PB: predicated region body
PF: predicated region fallthrough
CT: control target
= control target key end

     0   :  { %8 = vsyncpa [#allocation3], 0  ;;  %s4758_s0 = inlined_call_operand.hbm [shape: f32[4,16,128], index: 0, kind: input, shape index: {}]   ;;  %s4759_s1 = inlined_call_operand.hbm [shape: bf16[5,640,128], index: 1, kind: input, shape index: {}]   ;;  %s4760_s2 = inlined_call_operand.vmem [shape: f32[5,1,128], index: 2, kind: input, shape index: {}]   ;;  %s4761_s3 = inlined_call_operand.hbm [shape: f32[4,16,128], index: 3, kind: output, shape index: {}]  }
   0x1   :  { %10 = vsyncpa [#allocation3 + $0x1], 0 }
   0x2   :  { %11 = vsyncpa [#allocation6], 0 }
   0x3   :  { %12 = vsyncpa [#allocation4], 0 }
   0x4   :  { %14 = vsyncpa [#allocation4 + $0x1], 0  ;;  %s4320_s12 = smov 0   ;;  %s4322_s13 = smov 0  }
   0x5   :  { %s4324_s14 = smov 0   ;;  %s4326_s15 = smov 0  }
   0x6 LB: > { %s4341_s16 = sadd.s32 4294967295, %s4288_s15   ;;  %s3163_s17 = sadd.s32 4294967294, %s4288_s15   ;;  %s4288_s15 = sphi %s4326_s15, %s4783_s15   ;;  %s4284_s14 = sphi %s4324_s14, %s4782_s14   ;;  %s4280_s13 = sphi %s4322_s13, %s4781_s13   ;;  %s4276_s12 = sphi %s4320_s12, %s4780_s12  }
   0x7   : > { %p40_p0 = scmp.ne.s32.totalorder %s4280_s13, %s4276_s12  ;;  %p4762_p1 = scmp.eq.s32.totalorder %s4341_s16, 0 }
   0x8   : > { %p112_p3 = scmp.eq.s32.totalorder %s3163_s17, 1  ;;  %p3164_p5 = scmp.ge.s32.totalorder %s4288_s15, 1 }
   0x9   : > { %p4350_p4 = por %p4762_p1, %p40_p0  ;;  %p119_p7 = scmp.lt.s32.totalorder %s4288_s15, 3 }
   0xa   : > { %p4355_p6 = por %p112_p3, %p40_p0  ;;  %s4290_s21 = smov [#allocation5]  }
   0xb   : > { %s4765_s18 = scalar_select %p4350_p4, 1, 0 }
   0xc   : > { %s4766_s19 = scalar_select %p4355_p6, 1, 0 }
   0xd   : > { %p4360_p8 = pnand %p3164_p5, %p119_p7  ;;  %s131_s22 = sshll.u32 %s4290_s21, 4  ;;  %s4364_s22 = int_to_ptr.vmem [resolvable:$true] %s131_s22 }
   0xe   : > { %s4376_s24 = sadd.s32 1, %s4288_s15   ;;  %s27_s25 = sadd.s32 1, %s4284_s14 }
   0xf   : > { %s4767_s20 = scalar_select %p4360_p8, 1, 0 }
  0x10   : > { %p3872_p9 = pneg %p4360_p8  ;;  %s24_s26 = ssub.s32 %s4288_s15, %s4376_s24 }
  0x11   : > { %s4160_s29 = scalar_lea.hbm %s4759_s1, 25600 }
  0x12   : > { %p4371_p11 = pnand %p3872_p9, %p4762_p1  ;;  %p4161_p12 = scmp.ne.s32.totalorder %s4759_s1, %s4160_s29 }
  0x13   : > { %p4167_p5 = scmp.lt.u32.totalorder %s4160_s29, %s4759_s1 }
  0x14   : > { %p4162_p13 = pneg %p4371_p11 }
  0x16   : > { %p4163_p0 = pnand %p4162_p13, %p4161_p12 }
  0x18   : > { %p4164_p3 = pneg %p4163_p0 }
  0x1a   : > { %p4169_p7 = pnand %p4167_p5, %p4164_p3 }
  0x1c   : > { %4172 = shalt.err (!%p4169_p7)
}
  0x1d   : > { %s4173_s7 = scalar_lea.vmem %s4364_s22, 25600  ;;  %p4181_p2 = scmp.lt.s32.totalorder %s4364_s22, %s4364_s22 }
  0x1e   : > { %p4174_p9 = scmp.ne.s32.totalorder %s4364_s22, %s4173_s7  ;;  %p4182_p6 = scmp.lt.s32.totalorder %s4173_s7, %s4173_s7 }
  0x20   : > { %p4176_p10 = pnand %p4174_p9, %p4162_p13  ;;  %p4183_p4 = por %p4182_p6, %p4181_p2 }
  0x22   : > { %p4177_p1 = pneg %p4176_p10 }
  0x24   : > { %p4184_p8 = pnand %p4183_p4, %p4177_p1 }
  0x26   : > { %4187 = shalt.err (!%p4184_p8)
}
  0x27   : > { %s4291_s8 = smov 64   ;;  %s4292_s9 = smov 4  }
  0x28   : > { %3875 = dma.hbm_to_vmem [thread:$0]  (!%p4371_p11), %s4759_s1, 25600, %s4364_s22, [#allocation6], %s4291_s8, %s4291_s8, %s4292_s9  }
  0x29   : > { %p25_p2 = scmp.eq.s32.totalorder %s24_s26, 0  ;;  %p34_p1 = scmp.ne.s32.totalorder %s4284_s14, %s4280_s13 }
  0x2a   : > { %p35_p4 = scmp.eq.s32.totalorder %s4288_s15, 0  ;;  %p3885_p6 = scmp.lt.s32.totalorder %s4288_s15, 2 }
  0x2b   : > { %s4407_s17 = scalar_select %p25_p2, %s4284_s14, %s27_s25  }
  0x2c   : > { %p36_p8 = por %p35_p4, %p34_p1  ;;  %p4769_p10 = scmp.eq.s32.totalorder %s4341_s16, 1 }
  0x2d   : > { %s148_s27 = sand.u32 1, %s4284_s14   ;;  %s3431_s28 = sshll.u32 %s4288_s15, 9 }
  0x2e   : > { %p4411_p12 = por %p4769_p10, %p34_p1  ;;  %s3167_s29 = sshll.u32 %s148_s27, 5 }
  0x2f   : > { %s4420_s4 = scalar_lea.hbm %s4758_s0, %s3431_s28  ;;  %s152_s22 = scalar_lea.vmem [#allocation2], %s3167_s29 }
  0x30   : > { %s160_s25 = sshll.u32 %s152_s22, 4  ;;  %p4422_p11 = pnand %p3885_p6, %p36_p8  ;;  %s4426_s25 = int_to_ptr.vmem [resolvable:$true] %s160_s25 }
  0x31   : > { %s4428_s5 = scalar_lea.sflag [#allocation3], %s148_s27  ;;  %s4188_s6 = scalar_lea.hbm %s4420_s4, 512 }
  0x32   : > { %p4189_p13 = scmp.ne.s32.totalorder %s4420_s4, %s4188_s6  ;;  %p4190_p0 = pneg %p4422_p11 }
  0x33   : > { %s4193_s9 = scalar_lea.hbm %s4758_s0, 1024  ;;  %p4194_p7 = scmp.lt.u32.totalorder %s4420_s4, %s4758_s0 }
  0x34   : > { %p4191_p3 = pnand %p4190_p0, %p4189_p13  ;;  %p4195_p9 = scmp.lt.u32.totalorder %s4193_s9, %s4188_s6 }
  0x35   : > { %p4197_p1 = scmp.lt.u32.totalorder %s4188_s6, %s4420_s4 }
  0x36   : > { %p4192_p5 = pneg %p4191_p3  ;;  %p4196_p2 = por %p4195_p9, %p4194_p7 }
  0x38   : > { %p4198_p4 = por %p4197_p1, %p4196_p2 }
  0x3a   : > { %p4199_p6 = pnand %p4198_p4, %p4192_p5 }
  0x3c   : > { %4202 = shalt.err (!%p4199_p6)
}
  0x3d   : > { %s4203_s27 = scalar_lea.vmem %s4426_s25, 512  ;;  %s4293_s28 = smov [#allocation2]  }
  0x3e   : > { %p4204_p8 = scmp.ne.s32.totalorder %s4426_s25, %s4203_s27  ;;  %s4208_s29 = sshll.u32 %s4293_s28, 4  ;;  %s4209_s29 = int_to_ptr.vmem [resolvable:$false] %s4208_s29 }
  0x3f   : > { %s4210_s23 = scalar_lea.vmem %s4209_s29, 1024  ;;  %p4211_p3 = scmp.lt.s32.totalorder %s4426_s25, %s4209_s29 }
  0x40   : > { %p4206_p10 = pnand %p4204_p8, %p4190_p0  ;;  %p4212_p7 = scmp.lt.s32.totalorder %s4210_s23, %s4203_s27 }
  0x42   : > { %p4207_p13 = pneg %p4206_p10  ;;  %p4213_p9 = por %p4212_p7, %p4211_p3 }
  0x44   : > { %p4214_p2 = pnand %p4213_p9, %p4207_p13 }
  0x46   : > { %4217 = shalt.err (!%p4214_p2)
}
  0x47   : > { %s4294_s30 = smov 128   ;;  %s4295_s22 = smov 8  }
  0x48   : > { %3879 = dma.hbm_to_vmem [thread:$0]  (!%p4422_p11), %s4420_s4, 512, %s4426_s25, %s4428_s5, %s4294_s30, %s4294_s30, %s4295_s22  }
  0x49   : > { %p4772_p0 = scmp.ne.s32.totalorder %s4767_s20, 0 }
  0x4a   : > { %s4459_s6 = sand.u32 (!%p4772_p0), 1, %s4280_s13   ;;  %p4773_p5 = scmp.ne.s32.totalorder (!%p4772_p0), %s4765_s18, 0 }
  0x4b   : > { %172 = sbr.rel (%p4772_p0) target bundleno = 1459 (0x5b3), region = 32  ;;  %s3172_s7 = sshll.u32 (!%p4772_p0), %s4459_s6, 5 }
  0x4c   : > { %s175_s8 = scalar_lea.sflag (!%p4772_p0), [#allocation3], %s4459_s6  ;;  %s4465_s9 = scalar_lea.vmem (!%p4772_p0), [#allocation2], %s3172_s7 }
  0x52   : > { %4263 = dma.done.wait (%p4773_p5), %s175_s8, 512  }
  0x53   : > { %4265 = vsyncadd (%p4773_p5), %s175_s8, 4294966784  ;;  %p4774_p11 = scmp.eq.s32.totalorder %s4341_s16, 0 }
  0x55   : > { %4267 = dma.done.wait (%p4774_p11), [#allocation6], 25600   ;;  %p4775_p1 = pmov %p4774_p11 }
  0x56   : > { %v3928_v0 = vld [vmem:[#allocation5 + $0x40] sm:$0xff]   ;;  %v3932_v4 = vld [vmem:[#allocation5 + $0x48] sm:$0xff]   ;;  %v3936_v8 = vld [vmem:[#allocation5 + $0x50] sm:$0xff]   ;;  %vm216_vm0 = vcmask 1041408   ;;  %vm237_vm1 = vcmask 1046528   ;;  %vm267_vm2 = vcmask 1044480  }
  0x57   : > { %4269 = vsyncadd (%p4775_p1), [#allocation6], 4294941696  ;;  %v3929_v1 = vld [vmem:[#allocation5] sm:$0xff]   ;;  %3434 = vmatprep.subr.bf16.mxu0 %v3928_v0  ;;  %v3933_v5 = vld [vmem:[#allocation5 + $0x8] sm:$0xff]   ;;  %vm252_vm3 = vcmask 1045504   ;;  %vm282_vm5 = vcmask 1043456  }
  0x58   : > { %v3930_v2 = vld [vmem:[#allocation5 + $0xc0] sm:$0xff]   ;;  %3435 = vmatpush3.bf16.msra.mxu0 %v3929_v1  ;;  %v3934_v6 = vld [vmem:[#allocation5 + $0xc8] sm:$0xff]   ;;  %v3937_v9 = vld [vmem:[#allocation5 + $0x10] sm:$0xff]   ;;  %vm4296_vm6 = vmmov 1   ;;  %s204_s29 = scalar_lea.vmem [#allocation7], %s3172_s7  ;;  %s3433_s30 = sshll.u32 %s4341_s16, 9 }
  0x59   : > { %v3931_v3 = vld [vmem:[#allocation5 + $0x80] sm:$0xff]   ;;  %3462 = vmatprep.subr.bf16.mxu1 %v3930_v2  ;;  %3436 = vmatprep.subr.bf16.mxu0 %v3932_v4  ;;  %v3935_v7 = vld [vmem:[#allocation5 + $0x88] sm:$0xff]   ;;  %v3938_v10 = vld [vmem:[#allocation5 + $0xd0] sm:$0xff]   ;;  %s3080_s23 = sshll.u32 %s204_s29, 4  ;;  %s4714_s7 = scalar_lea.hbm %s4761_s3, %s3433_s30  ;;  %s4709_s23 = int_to_ptr.vmem [resolvable:$true] %s3080_s23 }
  0x5a   : > { %3463 = vmatpush3.bf16.msra.mxu1 %v3931_v3  ;;  %v3939_v11 = vld [vmem:[#allocation5 + $0x90] sm:$0xff]   ;;  %v3940_v12 = vld [vmem:[#allocation5 + $0x58] sm:$0xff]   ;;  %v3944_v16 = vld [vmem:[#allocation5 + $0x60] sm:$0xff]   ;;  %s3066_s16 = scalar_lea.sflag [#allocation4], %s4459_s6  ;;  %s4297_s18 = smov [#allocation7]  }
  0x5b   : > { %3464 = vmatprep.subr.bf16.mxu1 %v3934_v6  ;;  %v3941_v13 = vld [vmem:[#allocation5 + $0x18] sm:$0xff]   ;;  %v3945_v17 = vld [vmem:[#allocation5 + $0x20] sm:$0xff]   ;;  %v3948_v20 = vld [vmem:[#allocation5 + $0x68] sm:$0xff]   ;;  %s4222_s20 = sshll.u32 %s4297_s18, 4  ;;  %s4223_s20 = int_to_ptr.vmem [resolvable:$false] %s4222_s20 }
  0x5c   : > { %3437 = vmatpush3.bf16.msra.mxu0 %v3933_v5  ;;  %v3942_v14 = vld [vmem:[#allocation5 + $0xd8] sm:$0xff]   ;;  %v3946_v18 = vld [vmem:[#allocation5 + $0xe0] sm:$0xff]   ;;  %v3949_v21 = vld [vmem:[#allocation5 + $0x28] sm:$0xff]   ;;  %s4224_s4 = scalar_lea.vmem %s4223_s20, 1024  ;;  %p4225_p10 = scmp.lt.s32.totalorder %s4709_s23, %s4223_s20 }
  0x5d   : > { %3438 = vmatprep.subr.bf16.mxu0 %v3936_v8  ;;  %v3943_v15 = vld [vmem:[#allocation5 + $0x98] sm:$0xff]   ;;  %v3947_v19 = vld [vmem:[#allocation5 + $0xa0] sm:$0xff]   ;;  %v3950_v22 = vld [vmem:[#allocation5 + $0xe8] sm:$0xff]  }
  0x5e   : > { %3465 = vmatpush3.bf16.msra.mxu1 %v3935_v7  ;;  %v3951_v23 = vld [vmem:[#allocation5 + $0xa8] sm:$0xff]   ;;  %v3952_v24 = vld [vmem:[#allocation5 + $0x70] sm:$0xff]   ;;  %v3956_v28 = vld [vmem:[#allocation5 + $0x78] sm:$0xff]  }
  0x5f   : > { %3466 = vmatprep.subr.bf16.mxu1 %v3938_v10  ;;  %v3953_v25 = vld [vmem:[#allocation5 + $0x30] sm:$0xff]   ;;  %v3957_v29 = vld [vmem:[#allocation5 + $0x38] sm:$0xff]   ;;  %v208_v31 = vld [vmem:[%s4465_s9] sm:$0xff] }
  0x60   : > { %3439 = vmatpush3.bf16.msra.mxu0 %v3937_v9  ;;  %v3954_v26 = vld [vmem:[#allocation5 + $0xf0] sm:$0xff]   ;;  %v3958_v30 = vld [vmem:[#allocation5 + $0xf8] sm:$0xff]   ;;  %v209_v32 = vld [vmem:[%s4465_s9 + $0x8] sm:$0xff]  ;;  %v217_v33 = vrot.slane %v208_v31, 6 }
  0x61   : > { %3440 = vmatprep.subr.bf16.mxu0 %v3940_v12  ;;  %v3955_v27 = vld [vmem:[#allocation5 + $0xb0] sm:$0xff]   ;;  %v218_v34 = vrot.slane %v209_v32, 6  ;;  %v3959_v35 = vld [vmem:[#allocation5 + $0xb8] sm:$0xff]   ;;  %v3960_v36 = vld [vmem:[#allocation5 + $0x100] sm:$0xff]  }
  0x62   : > { %3467 = vmatpush3.bf16.msra.mxu1 %v3939_v11  ;;  %v229_v38 = vsel %vm216_vm0, 0.0, %v217_v33  ;;  %vm3216_vm4 = vmneg %vm216_vm0  ;;  %v3961_v56 = vld [vmem:[#allocation5 + $0x108] sm:$0xff]   ;;  %v210_v61 = vld [vmem:[%s4465_s9 + $0x10] sm:$0xff] }
  0x63   : > { %3468 = vmatprep.subr.bf16.mxu1 %v3942_v14  ;;  %v4478_v37 = vsel %vm216_vm0, %v217_v33, %v218_v34  ;;  %v4482_v39 = vsel %vm216_vm0, %v218_v34, 0.0  ;;  %v238_v40 = vrot.slane %v229_v38, 1  ;;  %v268_v44 = vrot.slane %v229_v38, 3  ;;  %vm4492_vm7 = vmpackc.low %vm4296_vm6, %vm3216_vm4  ;;  %v211_v62 = vld [vmem:[%s4465_s9 + $0x18] sm:$0xff]  ;;  %v3962_v8 = vld [vmem:[#allocation5 + $0x110] sm:$0xff]   ;;  %s4218_s9 = scalar_lea.vmem %s4709_s23, 512 }
  0x64   : > { %3441 = vmatpush3.bf16.msra.mxu0 %v3941_v13  ;;  %v239_v41 = vrot.slane %v4478_v37, 1  ;;  %v241_v42 = vrot.slane %v4482_v39, 1  ;;  %v3218_v43 = vpack.c.bf16 %v4478_v37, %v217_v33  ;;  %v269_v45 = vrot.slane %v4478_v37, 3  ;;  %v3964_v34 = vld [vmem:[#allocation5 + $0x120] sm:$0xff]   ;;  %p4219_p4 = scmp.ne.s32.totalorder %s4709_s23, %s4218_s9  ;;  %p4226_p13 = scmp.lt.s32.totalorder %s4224_s4, %s4218_s9 }
  0x65   : > { %3442 = vmatprep.subr.bf16.mxu0 %v3944_v16  ;;  %v271_v46 = vrot.slane %v4482_v39, 3  ;;  %v253_v47 = vrot.slane %v229_v38, 2  ;;  %v254_v51 = vrot.slane %v4478_v37, 2  ;;  %v256_v52 = vrot.slane %v4482_v39, 2 }
  0x66   : > { %3469 = vmatpush3.bf16.msra.mxu1 %v3943_v15  ;;  %v240_v48 = vsel %vm237_vm1, %v238_v40, %v239_v41  ;;  %v242_v49 = vsel %vm237_vm1, %v239_v41, %v241_v42  ;;  %v270_v54 = vsel %vm267_vm2, %v268_v44, %v269_v45  ;;  %v283_v57 = vrot.slane %v229_v38, 4  ;;  %v3968_v41 = vld [vmem:[#allocation5 + $0x180] sm:$0xff]   ;;  %p4220_p6 = pnand %p4219_p4, %p4411_p12  ;;  %p4227_p3 = por %p4226_p13, %p4225_p10 }
  0x67   : > { %3470 = vmatprep.subr.bf16.mxu1 %v3946_v18  ;;  %v298_v53 = vpack.c.bf16 %v242_v49, %v240_v48  ;;  %v272_v55 = vsel %vm267_vm2, %v269_v45, %v271_v46  ;;  %v255_v59 = vsel %vm252_vm3, %v253_v47, %v254_v51  ;;  %v257_v60 = vsel %vm252_vm3, %v254_v51, %v256_v52  ;;  %v3969_v42 = vld [vmem:[#allocation5 + $0x140] sm:$0xff]   ;;  %v3972_v45 = vld [vmem:[#allocation5 + $0x188] sm:$0xff]   ;;  %v3976_v49 = vld [vmem:[#allocation5 + $0x190] sm:$0xff]  }
  0x68   : > { %3443 = vmatpush3.bf16.msra.mxu0 %v3945_v17  ;;  %v300_v58 = vpack.c.bf16 %v272_v55, %v270_v54  ;;  %v284_v63 = vrot.slane %v4478_v37, 4  ;;  %v299_v0 = vpack.c.bf16 %v257_v60, %v255_v59  ;;  %v220_v1 = vrot.slane %v210_v61, 6  ;;  %v3963_v17 = vld [vmem:[#allocation5 + $0x118] sm:$0xff]   ;;  %v3971_v44 = vld [vmem:[#allocation5 + $0x1c0] sm:$0xff]   ;;  %v3973_v46 = vld [vmem:[#allocation5 + $0x148] sm:$0xff]   ;;  %p4221_p8 = pneg %p4220_p6 }
  0x69   : > { %3444 = vmatprep.subr.bf16.mxu0 %v3948_v20  ;;  %666 = vmatprep.mubr.bf16.mxu0 %v298_v53  ;;  %v221_v2 = vrot.slane %v211_v62, 6  ;;  %v286_v7 = vrot.slane %v4482_v39, 4  ;;  %v3967_v37 = vld [vmem:[#allocation5 + $0x138] sm:$0xff]   ;;  %v3974_v47 = vld [vmem:[#allocation5 + $0x208] sm:$0xff]   ;;  %v3977_v51 = vld [vmem:[#allocation5 + $0x150] sm:$0xff]  }
  0x6a   : > { %3471 = vmatpush3.bf16.msra.mxu1 %v3947_v19  ;;  %715 = vmatprep.mubr.bf16.mxu1 %v300_v58  ;;  %v285_v3 = vsel %vm282_vm5, %v283_v57, %v284_v63  ;;  %v230_v5 = vsel %vm216_vm0, 0.0, %v220_v1  ;;  %v3975_v48 = vld [vmem:[#allocation5 + $0x1c8] sm:$0xff]   ;;  %v3978_v52 = vld [vmem:[#allocation5 + $0x210] sm:$0xff]   ;;  %v3980_v54 = vld [vmem:[#allocation5 + $0x198] sm:$0xff]   ;;  %p4228_p7 = pnand %p4227_p3, %p4221_p8 }
  0x6b   : > { %3472 = vmatprep.subr.bf16.mxu1 %v3950_v22  ;;  %v222_v4 = vsel %vm216_vm0, %v220_v1, %v221_v2  ;;  %v232_v6 = vsel %vm216_vm0, %v221_v2, 0.0  ;;  %v243_v9 = vrot.slane %v230_v5, 1  ;;  %v273_v13 = vrot.slane %v230_v5, 3  ;;  %v3979_v53 = vld [vmem:[#allocation5 + $0x1d0] sm:$0xff]   ;;  %v3981_v55 = vld [vmem:[#allocation5 + $0x158] sm:$0xff]   ;;  %v3984_v58 = vld [vmem:[#allocation5 + $0x1a0] sm:$0xff]  }
  0x6c   : > { %3445 = vmatpush3.bf16.msra.mxu0 %v3949_v21  ;;  %v244_v10 = vrot.slane %v222_v4, 1  ;;  %v246_v11 = vrot.slane %v232_v6, 1  ;;  %v3222_v12 = vpack.c.bf16 %v222_v4, %v220_v1  ;;  %v274_v14 = vrot.slane %v222_v4, 3  ;;  %v3983_v57 = vld [vmem:[#allocation5 + $0x1d8] sm:$0xff]   ;;  %v3985_v59 = vld [vmem:[#allocation5 + $0x160] sm:$0xff]   ;;  %v3988_v62 = vld [vmem:[#allocation5 + $0x1a8] sm:$0xff]  }
  0x6d   : > { %3446 = vmatprep.subr.bf16.mxu0 %v3952_v24  ;;  %v276_v15 = vrot.slane %v232_v6, 3  ;;  %v258_v16 = vrot.slane %v230_v5, 2  ;;  %v259_v20 = vrot.slane %v222_v4, 2  ;;  %v261_v21 = vrot.slane %v232_v6, 2  ;;  %v3986_v60 = vld [vmem:[#allocation5 + $0x220] sm:$0xff]   ;;  %v3991_v1 = vld [vmem:[#allocation5 + $0x1e8] sm:$0xff]  }
  0x6e   : > { %3473 = vmatpush3.bf16.msra.mxu1 %v3951_v23  ;;  %v245_v18 = vsel %vm237_vm1, %v243_v9, %v244_v10  ;;  %v247_v19 = vsel %vm237_vm1, %v244_v10, %v246_v11  ;;  %v275_v23 = vsel %vm267_vm2, %v273_v13, %v274_v14  ;;  %v288_v31 = vrot.slane %v230_v5, 4  ;;  %v3987_v61 = vld [vmem:[#allocation5 + $0x1e0] sm:$0xff]   ;;  %v3992_v2 = vld [vmem:[#allocation5 + $0x1b0] sm:$0xff]   ;;  %v3999_v9 = vld [vmem:[#allocation5 + $0x1f8] sm:$0xff]  }
  0x6f   : > { %3474 = vmatprep.subr.bf16.mxu1 %v3954_v26  ;;  %v303_v22 = vpack.c.bf16 %v247_v19, %v245_v18  ;;  %v277_v24 = vsel %vm267_vm2, %v274_v14, %v276_v15  ;;  %v289_v32 = vrot.slane %v222_v4, 4  ;;  %v291_v33 = vrot.slane %v232_v6, 4  ;;  %v3994_v4 = vld [vmem:[#allocation5 + $0x230] sm:$0xff]   ;;  %v3996_v6 = vld [vmem:[#allocation5 + $0x1b8] sm:$0xff]   ;;  %v4523_v10 = vld [vmem:[#allocation5 + $0x240] sm:$0xff]  }
  0x70   : > { %3447 = vmatpush3.bf16.msra.mxu0 %v3953_v25  ;;  %v287_v25 = vsel %vm282_vm5, %v284_v63, %v286_v7  ;;  %v305_v26 = vpack.c.bf16 %v277_v24, %v275_v23  ;;  %v3989_v63 = vld [vmem:[#allocation5 + $0x168] sm:$0xff]   ;;  %v3995_v5 = vld [vmem:[#allocation5 + $0x1f0] sm:$0xff]   ;;  %v3997_v7 = vld [vmem:[#allocation5 + $0x178] sm:$0xff]  }
  0x71   : > { %3448 = vmatprep.subr.bf16.mxu0 %v3956_v28  ;;  %v262_v28 = vsel %vm252_vm3, %v259_v20, %v261_v21  ;;  %v290_v38 = vsel %vm282_vm5, %v288_v31, %v289_v32  ;;  %v292_v39 = vsel %vm282_vm5, %v289_v32, %v291_v33 }
  0x72   : > { %3475 = vmatpush3.bf16.msra.mxu1 %v3955_v27  ;;  %v260_v27 = vsel %vm252_vm3, %v258_v16, %v259_v20  ;;  %v306_v40 = vpack.c.bf16 %v292_v39, %v290_v38 }
  0x73   : > { %3476 = vmatprep.subr.bf16.mxu1 %v3958_v30  ;;  %v304_v30 = vpack.c.bf16 %v262_v28, %v260_v27 }
  0x74   : > { %3449 = vmatpush3.bf16.msra.mxu0 %v3957_v29  ;;  %v301_v29 = vpack.c.bf16 %v287_v25, %v285_v3  ;;  %v3993_v3 = vld [vmem:[#allocation5 + $0x170] sm:$0xff]  }
  0x75   : > { %3764 = vmatprep.subr.bf16.mxu0 %v3960_v36 }
  0x76   : > { %3477 = vmatpush3.bf16.msra.mxu1 %v3959_v35  ;;  %v3965_v35 = vld [vmem:[#allocation5 + $0x128] sm:$0xff]  }
  0x77   : > { %3219 = vmatmul.mubr.msk.bf16.vlgmr.msra.gmra.mrb[0].mxu0 %vm4492_vm7, %v3218_v43  ;;  %v3970_v43 = vld [vmem:[#allocation5 + $0x200] sm:$0xff]   ;;  %3500 = vmatprep.subr.bf16.mxu1 %v3968_v41 }
  0x78   : > { %3765 = vmatpush3.bf16.msra.mxu0 %v3960_v36  ;;  %674 = vmatprep.mubr.bf16.mxu0 %v303_v22  ;;  %v3966_v36 = vld [vmem:[#allocation5 + $0x130] sm:$0xff]  }
  0x79   : > { %716 = vmatmul.mubr.bf16.vlgmr.msra.gmra.mrb[0].mxu1 %v299_v0  ;;  %3766 = vmatprep.subr.bf16.mxu0 %v3961_v56  ;;  %v3990_v0 = vld [vmem:[#allocation5 + $0x228] sm:$0xff]  }
  0x7a   : > { %723 = vmatprep.mubr.bf16.mxu1 %v305_v26  ;;  %3501 = vmatpush3.bf16.msra.mxu1 %v3969_v42 }
  0x7b   : > { %3502 = vmatprep.subr.bf16.mxu1 %v3972_v45 }
  0x7c   : > { %3767 = vmatpush3.bf16.msra.mxu0 %v3961_v56  ;;  %v3982_v56 = vld [vmem:[#allocation5 + $0x218] sm:$0xff]  }
  0x7d   : > { %3768 = vmatprep.subr.bf16.mxu0 %v3962_v8 }
  0x7e   : > { %3503 = vmatpush3.bf16.msra.mxu1 %v3973_v46 }
  0x7f   : > { %3223 = vmatmul.mubr.msk.bf16.gmra.mrb[4].mxu0 %vm4492_vm7, %v3222_v12  ;;  %3504 = vmatprep.subr.bf16.mxu1 %v3976_v49  ;;  %v3175_v12 = vld [vmem:[%s4760_s2] ss:$0 sm:$0xff] }
  0x80   : > { %3769 = vmatpush3.bf16.msra.mxu0 %v3962_v8  ;;  %3780 = vmatprep.mubr.bf16.mxu0 %v301_v29  ;;  %v3998_v8 = vld [vmem:[#allocation5 + $0x238] sm:$0xff]  }
  0x81   : > { %724 = vmatmul.mubr.bf16.gmra.mrb[4].mxu1 %v304_v30  ;;  %3770 = vmatprep.subr.bf16.mxu0 %v3963_v17 }
  0x82   : > { %3505 = vmatpush3.bf16.msra.mxu1 %v3977_v51 }
  0x83   : > { %3506 = vmatprep.subr.bf16.mxu1 %v3980_v54 }
  0x84   : > { %3771 = vmatpush3.bf16.msra.mxu0 %v3963_v17 }
  0x85   : > { %3772 = vmatprep.subr.bf16.mxu0 %v3964_v34 }
  0x86   : > { %3507 = vmatpush3.bf16.msra.mxu1 %v3981_v55 }
  0x87   : > { %3508 = vmatprep.subr.bf16.mxu1 %v3984_v58 }
  0x88   : > { %3773 = vmatpush3.bf16.msra.mxu0 %v3964_v34 }
  0x89   : > { %3774 = vmatprep.subr.bf16.mxu0 %v3965_v35 }
  0x8a   : > { %3509 = vmatpush3.bf16.msra.mxu1 %v3985_v59 }
  0x8b   : > { %3510 = vmatprep.subr.bf16.mxu1 %v3988_v62 }
  0x8c   : > { %3775 = vmatpush3.bf16.msra.mxu0 %v3965_v35 }
  0x8d   : > { %3776 = vmatprep.subr.bf16.mxu0 %v3966_v36 }
  0x8e   : > { %3511 = vmatpush3.bf16.msra.mxu1 %v3989_v63 }
  0x8f   : > { %3512 = vmatprep.subr.bf16.mxu1 %v3992_v2 }
  0x90   : > { %3777 = vmatpush3.bf16.msra.mxu0 %v3966_v36 }
  0x91   : > { %3778 = vmatprep.subr.bf16.mxu0 %v3967_v37 }
  0x92   : > { %3513 = vmatpush3.bf16.msra.mxu1 %v3993_v3 }
  0x93   : > { %3514 = vmatprep.subr.bf16.mxu1 %v3996_v6 }
  0x94   : > { %3779 = vmatpush3.bf16.msra.mxu0 %v3967_v37 }
  0x95   : > { %3528 = vmatprep.subr.bf16.mxu0 %v3970_v43 }
  0x96   : > { %3515 = vmatpush3.bf16.msra.mxu1 %v3997_v7 }
  0x97   : > { %3781 = vmatmul.mubr.bf16.vlgmr.msra.gmra.mrb[8].mxu0 %v306_v40  ;;  %3784 = vmatprep.subr.bf16.mxu1 %v4523_v10 }
  0x98   : > { %3529 = vmatpush3.bf16.msra.mxu0 %v3971_v44 }
  0x99   : > { %3530 = vmatprep.subr.bf16.mxu0 %v3974_v47 }
  0x9c   : > { %3531 = vmatpush3.bf16.msra.mxu0 %v3975_v48 }
  0x9d   : > { %3532 = vmatprep.subr.bf16.mxu0 %v3978_v52 }
  0xa0   : > { %3533 = vmatpush3.bf16.msra.mxu0 %v3979_v53 }
  0xa1   : > { %3534 = vmatprep.subr.bf16.mxu0 %v3982_v56 }
  0xa4   : > { %3535 = vmatpush3.bf16.msra.mxu0 %v3983_v57 }
  0xa5   : > { %3536 = vmatprep.subr.bf16.mxu0 %v3986_v60 }
  0xa8   : > { %3537 = vmatpush3.bf16.msra.mxu0 %v3987_v61 }
  0xa9   : > { %3538 = vmatprep.subr.bf16.mxu0 %v3990_v0 }
  0xac   : > { %3539 = vmatpush3.bf16.msra.mxu0 %v3991_v1 }
  0xad   : > { %3540 = vmatprep.subr.bf16.mxu0 %v3994_v4 }
  0xb0   : > { %3541 = vmatpush3.bf16.msra.mxu0 %v3995_v5 }
  0xb1   : > { %3542 = vmatprep.subr.bf16.mxu0 %v3998_v8 }
  0xb4   : > { %3543 = vmatpush3.bf16.msra.mxu0 %v3999_v9 }
 0x14a   : > { %v3450_v11 = vpop.f32.mrb[0].mxu0 }
 0x14b   : > { %v3451_v13 = vpop.f32.mrb[1].mxu0 }
 0x14c   : > { %v3478_v14 = vpop.f32.mrb[0].mxu1  ;;  %v3452_v15 = vadd.f32 %v3451_v13, %v3450_v11  ;;  %v3453_v16 = vpop.f32.mrb[2].mxu0 }
 0x14d   : > { %v3479_v17 = vpop.f32.mrb[1].mxu1  ;;  %v3454_v18 = vpop.f32.mrb[3].mxu0 }
 0x14e   : > { %v3480_v19 = vadd.f32 %v3479_v17, %v3478_v14  ;;  %v3481_v20 = vpop.f32.mrb[2].mxu1  ;;  %v669_v21 = vadd.f32 %v3452_v15, %v3175_v12  ;;  %v3455_v22 = vadd.f32 %v3454_v18, %v3453_v16 }
 0x14f   : > { %v3482_v23 = vpop.f32.mrb[3].mxu1 }
 0x150   : > { %v3483_v24 = vadd.f32 %v3482_v23, %v3481_v20  ;;  %v672_v25 = vadd.f32 %v3455_v22, %v3175_v12  ;;  %v718_v26 = vadd.f32 %v3480_v19, %v669_v21 }
 0x152   : > { %v3456_v27 = vpop.f32.mrb[4].mxu0  ;;  %v721_v28 = vadd.f32 %v3483_v24, %v672_v25 }
 0x153   : > { %v3457_v29 = vpop.f32.mrb[5].mxu0 }
 0x154   : > { %v3484_v30 = vpop.f32.mrb[4].mxu1  ;;  %v3458_v31 = vadd.f32 %v3457_v29, %v3456_v27  ;;  %v3459_v32 = vpop.f32.mrb[6].mxu0 }
 0x155   : > { %v3485_v33 = vpop.f32.mrb[5].mxu1  ;;  %v3460_v34 = vpop.f32.mrb[7].mxu0 }
 0x156   : > { %v3486_v35 = vadd.f32 %v3485_v33, %v3484_v30  ;;  %v3487_v36 = vpop.f32.mrb[6].mxu1  ;;  %v677_v37 = vadd.f32 %v3458_v31, %v3175_v12  ;;  %v3461_v38 = vadd.f32 %v3460_v34, %v3459_v32  ;;  %v4001_v30 = vld [vmem:[#allocation5 + $0x248] sm:$0xff]  }
 0x157   : > { %v3488_v39 = vpop.f32.mrb[7].mxu1 }
 0x158   : > { %v3489_v40 = vadd.f32 %v3488_v39, %v3487_v36  ;;  %v680_v41 = vadd.f32 %v3461_v38, %v3175_v12  ;;  %v726_v42 = vadd.f32 %v3486_v35, %v677_v37 }
 0x15a   : > { %v729_v43 = vadd.f32 %v3489_v40, %v680_v41 }
 0x16a   : > { %v3782_v44 = vpop.f32.mrb[8].mxu0 }
 0x16b   : > { %v775_v45 = vadd.f32 %v3782_v44, %v726_v42  ;;  %v766_v46 = vpop.f32.mrb[9].mxu0  ;;  %v4002_v44 = vld [vmem:[#allocation5 + $0x250] sm:$0xff]  }
 0x16c   : > { %v767_v47 = vadd.f32 %v766_v46, %v718_v26  ;;  %v3783_v48 = vpop.f32.mrb[10].mxu0 }
 0x16d   : > { %4128 = vtanh.f32 %v775_v45  ;;  %v778_v49 = vadd.f32 %v3783_v48, %v729_v43  ;;  %v769_v51 = vpop.f32.mrb[11].mxu0 }
 0x16e   : > { %4130 = vtanh.f32 %v767_v47  ;;  %v770_v52 = vadd.f32 %v769_v51, %v721_v28 }
 0x16f   : > { %4132 = vtanh.f32 %v778_v49 }
 0x170   : > { %4134 = vtanh.f32 %v770_v52 }
 0x177   : > { %v4129_v53 = vpop.eup %4128 }
 0x178   : > { %v4131_v54 = vpop.eup %4130  ;;  %v4529_v55 = vrot.slane %v4129_v53, 6 }
 0x179   : > { %v4133_v56 = vpop.eup %4132  ;;  %v789_v57 = vrot.slane %v4131_v54, 6 }
 0x17a   : > { %v4135_v58 = vpop.eup %4134  ;;  %v802_v59 = vsel %vm216_vm0, 0.0, %v4529_v55  ;;  %v793_v60 = vrot.slane %v4133_v56, 6  ;;  %v4003_v56 = vld [vmem:[#allocation5 + $0x258] sm:$0xff]  }
 0x17b   : > { %v856_v61 = vrot.slane %v802_v59, 4  ;;  %v801_v62 = vsel %vm216_vm0, 0.0, %v789_v57  ;;  %v790_v63 = vrot.slane %v4135_v58, 6  ;;  %v814_v0 = vrot.slane %v802_v59, 1  ;;  %v4005_v58 = vld [vmem:[#allocation5 + $0x268] sm:$0xff]  }
 0x17c   : > { %v823_v1 = vrot.slane %v801_v62, 2  ;;  %v4536_v2 = vsel %vm216_vm0, %v4529_v55, %v793_v60  ;;  %v804_v3 = vsel %vm216_vm0, %v793_v60, 0.0  ;;  %v809_v4 = vrot.slane %v801_v62, 1  ;;  %v4007_v60 = vld [vmem:[#allocation5 + $0x278] sm:$0xff]  }
 0x17d   : > { %v857_v5 = vrot.slane %v4536_v2, 4  ;;  %v859_v6 = vrot.slane %v804_v3, 4  ;;  %v791_v7 = vsel %vm216_vm0, %v789_v57, %v790_v63  ;;  %v803_v8 = vsel %vm216_vm0, %v790_v63, 0.0  ;;  %v4010_v63 = vld [vmem:[#allocation5 + $0x340] sm:$0xff]  }
 0x17e   : > { %v826_v9 = vrot.slane %v803_v8, 2  ;;  %v3268_v11 = vpack.c.bf16 %v791_v7, %v789_v57  ;;  %v810_v12 = vrot.slane %v791_v7, 1  ;;  %v812_v13 = vrot.slane %v803_v8, 1  ;;  %v4004_v57 = vld [vmem:[#allocation5 + $0x260] sm:$0xff]  }
 0x17f   : > { %v837_v14 = vrot.slane %v801_v62, 3  ;;  %v838_v15 = vrot.slane %v791_v7, 3  ;;  %v840_v16 = vrot.slane %v803_v8, 3  ;;  %v824_v17 = vrot.slane %v791_v7, 2 }
 0x180   : > { %v811_v18 = vsel %vm237_vm1, %v809_v4, %v810_v12  ;;  %v813_v19 = vsel %vm237_vm1, %v810_v12, %v812_v13  ;;  %v815_v20 = vrot.slane %v4536_v2, 1  ;;  %v817_v21 = vrot.slane %v804_v3, 1  ;;  %v4015_v4 = vld [vmem:[#allocation5 + $0x308] sm:$0xff]   ;;  %v4022_v12 = vld [vmem:[#allocation5 + $0x358] sm:$0xff]  }
 0x181   : > { %v866_v22 = vpack.c.bf16 %v813_v19, %v811_v18  ;;  %v839_v23 = vsel %vm267_vm2, %v837_v14, %v838_v15  ;;  %v841_v24 = vsel %vm267_vm2, %v838_v15, %v840_v16  ;;  %v825_v25 = vsel %vm252_vm3, %v823_v1, %v824_v17  ;;  %v4012_v1 = vld [vmem:[#allocation5 + $0x2c8] sm:$0xff]   ;;  %v4023_v13 = vld [vmem:[#allocation5 + $0x318] sm:$0xff]   ;;  %v4024_v14 = vld [vmem:[#allocation5 + $0x2e0] sm:$0xff]  }
 0x182   : > { %v868_v26 = vpack.c.bf16 %v841_v24, %v839_v23  ;;  %v827_v27 = vsel %vm252_vm3, %v824_v17, %v826_v9  ;;  %v816_v28 = vsel %vm237_vm1, %v814_v0, %v815_v20  ;;  %v818_v29 = vsel %vm237_vm1, %v815_v20, %v817_v21  ;;  %v4011_v0 = vld [vmem:[#allocation5 + $0x300] sm:$0xff]   ;;  %v4020_v9 = vld [vmem:[#allocation5 + $0x2d8] sm:$0xff]   ;;  %v4028_v18 = vld [vmem:[#allocation5 + $0x2e8] sm:$0xff]  }
 0x183   : > { %1236 = vmatprep.mubr.bf16.mxu1 %v866_v22  ;;  %v867_v31 = vpack.c.bf16 %v827_v27, %v825_v25  ;;  %v871_v32 = vpack.c.bf16 %v818_v29, %v816_v28  ;;  %v842_v33 = vrot.slane %v802_v59, 3  ;;  %v843_v34 = vrot.slane %v4536_v2, 3  ;;  %v4025_v15 = vld [vmem:[#allocation5 + $0x2a0] sm:$0xff]   ;;  %v4029_v19 = vld [vmem:[#allocation5 + $0x2a8] sm:$0xff]   ;;  %v4032_v22 = vld [vmem:[#allocation5 + $0x2f0] sm:$0xff]  }
 0x184   : > { %1285 = vmatprep.mubr.bf16.mxu0 %v868_v26  ;;  %3269 = vmatmul.mubr.msk.bf16.vlgmr.msra.gmra.mrb[8].mxu1 %vm4492_vm7, %v3268_v11  ;;  %v845_v35 = vrot.slane %v804_v3, 3  ;;  %v3272_v36 = vpack.c.bf16 %v4536_v2, %v4529_v55  ;;  %v828_v37 = vrot.slane %v802_v59, 2  ;;  %v829_v38 = vrot.slane %v4536_v2, 2  ;;  %v4006_v59 = vld [vmem:[#allocation5 + $0x270] sm:$0xff]   ;;  %v4014_v2 = vld [vmem:[#allocation5 + $0x348] sm:$0xff]   ;;  %v4021_v11 = vld [vmem:[#allocation5 + $0x298] sm:$0xff]  }
 0x185   : > { %1286 = vmatmul.mubr.bf16.vlgmr.msra.gmra.mrb[12].mxu0 %v867_v31  ;;  %3785 = vmatpush3.bf16.msra.mxu1 %v4523_v10  ;;  %v844_v39 = vsel %vm267_vm2, %v842_v33, %v843_v34  ;;  %v831_v40 = vrot.slane %v804_v3, 2  ;;  %v851_v41 = vrot.slane %v801_v62, 4  ;;  %v852_v42 = vrot.slane %v791_v7, 4  ;;  %v4009_v62 = vld [vmem:[#allocation5 + $0x280] sm:$0xff]   ;;  %v4013_v3 = vld [vmem:[#allocation5 + $0x288] sm:$0xff]   ;;  %v4018_v7 = vld [vmem:[#allocation5 + $0x350] sm:$0xff]  }
 0x186   : > { %1244 = vmatprep.mubr.bf16.mxu1 %v871_v32  ;;  %v846_v43 = vsel %vm267_vm2, %v843_v34, %v845_v35  ;;  %3786 = vmatprep.subr.bf16.mxu1 %v4001_v30  ;;  %v830_v45 = vsel %vm252_vm3, %v828_v37, %v829_v38  ;;  %v854_v46 = vrot.slane %v803_v8, 4  ;;  %v858_v47 = vsel %vm282_vm5, %v856_v61, %v857_v5  ;;  %v4008_v61 = vld [vmem:[#allocation5 + $0x2c0] sm:$0xff]   ;;  %v4019_v8 = vld [vmem:[#allocation5 + $0x310] sm:$0xff]   ;;  %v4030_v20 = vld [vmem:[#allocation5 + $0x368] sm:$0xff]  }
 0x187   : > { %v873_v48 = vpack.c.bf16 %v846_v43, %v844_v39  ;;  %v832_v49 = vsel %vm252_vm3, %v829_v38, %v831_v40  ;;  %v853_v10 = vsel %vm282_vm5, %v851_v41, %v852_v42  ;;  %v860_v51 = vsel %vm282_vm5, %v857_v5, %v859_v6  ;;  %3566 = vmatprep.subr.bf16.mxu0 %v4008_v61  ;;  %v4016_v5 = vld [vmem:[#allocation5 + $0x2d0] sm:$0xff]   ;;  %v4026_v16 = vld [vmem:[#allocation5 + $0x360] sm:$0xff]   ;;  %v4031_v21 = vld [vmem:[#allocation5 + $0x328] sm:$0xff]  }
 0x188   : > { %v872_v52 = vpack.c.bf16 %v832_v49, %v830_v45  ;;  %v855_v53 = vsel %vm282_vm5, %v852_v42, %v854_v46  ;;  %v874_v54 = vpack.c.bf16 %v860_v51, %v858_v47  ;;  %3567 = vmatpush3.bf16.msra.mxu0 %v4009_v62  ;;  %v4017_v6 = vld [vmem:[#allocation5 + $0x290] sm:$0xff]   ;;  %v4027_v17 = vld [vmem:[#allocation5 + $0x320] sm:$0xff]   ;;  %v4036_v26 = vld [vmem:[#allocation5 + $0x2f8] sm:$0xff]  }
 0x189   : > { %1293 = vmatprep.mubr.bf16.mxu0 %v873_v48  ;;  %3787 = vmatpush3.bf16.msra.mxu1 %v4001_v30  ;;  %v869_v55 = vpack.c.bf16 %v855_v53, %v853_v10  ;;  %v4034_v23 = vld [vmem:[#allocation5 + $0x370] sm:$0xff]   ;;  %v4038_v27 = vld [vmem:[#allocation5 + $0x378] sm:$0xff]   ;;  %v4568_v30 = vld [vmem:[#allocation5 + $0x380] sm:$0xff]  }
 0x18a   : > { %3788 = vmatprep.subr.bf16.mxu1 %v4002_v44  ;;  %3568 = vmatprep.subr.bf16.mxu0 %v4012_v1  ;;  %v4033_v24 = vld [vmem:[#allocation5 + $0x2b0] sm:$0xff]   ;;  %v4037_v28 = vld [vmem:[#allocation5 + $0x2b8] sm:$0xff]   ;;  %v3225_v33 = vld [vmem:[%s4760_s2 + $0x1] ss:$0 sm:$0xff] }
 0x18b   : > { %v4035_v25 = vld [vmem:[#allocation5 + $0x330] sm:$0xff]   ;;  %v4039_v29 = vld [vmem:[#allocation5 + $0x338] sm:$0xff]  }
 0x18c   : > { %3273 = vmatmul.mubr.msk.bf16.gmra.mrb[12].mxu1 %vm4492_vm7, %v3272_v36  ;;  %3569 = vmatpush3.bf16.msra.mxu0 %v4013_v3 }
 0x18d   : > { %1294 = vmatmul.mubr.bf16.gmra.mrb[16].mxu0 %v872_v52  ;;  %3789 = vmatpush3.bf16.msra.mxu1 %v4002_v44 }
 0x18e   : > { %3800 = vmatprep.mubr.bf16.mxu1 %v869_v55  ;;  %3790 = vmatprep.subr.bf16.mxu1 %v4003_v56 }
 0x18f   : > { %3570 = vmatprep.subr.bf16.mxu0 %v4016_v5 }
 0x190   : > { %3571 = vmatpush3.bf16.msra.mxu0 %v4017_v6 }
 0x191   : > { %3791 = vmatpush3.bf16.msra.mxu1 %v4003_v56  ;;  %3572 = vmatprep.subr.bf16.mxu0 %v4020_v9 }
 0x192   : > { %3792 = vmatprep.subr.bf16.mxu1 %v4004_v57 }
 0x194   : > { %3573 = vmatpush3.bf16.msra.mxu0 %v4021_v11 }
 0x195   : > { %3793 = vmatpush3.bf16.msra.mxu1 %v4004_v57  ;;  %3574 = vmatprep.subr.bf16.mxu0 %v4024_v14 }
 0x196   : > { %3794 = vmatprep.subr.bf16.mxu1 %v4005_v58 }
 0x198   : > { %3575 = vmatpush3.bf16.msra.mxu0 %v4025_v15 }
 0x199   : > { %3795 = vmatpush3.bf16.msra.mxu1 %v4005_v58  ;;  %3576 = vmatprep.subr.bf16.mxu0 %v4028_v18 }
 0x19a   : > { %3796 = vmatprep.subr.bf16.mxu1 %v4006_v59 }
 0x19c   : > { %3577 = vmatpush3.bf16.msra.mxu0 %v4029_v19 }
 0x19d   : > { %3797 = vmatpush3.bf16.msra.mxu1 %v4006_v59  ;;  %3578 = vmatprep.subr.bf16.mxu0 %v4032_v22 }
 0x19e   : > { %3798 = vmatprep.subr.bf16.mxu1 %v4007_v60 }
 0x1a0   : > { %3579 = vmatpush3.bf16.msra.mxu0 %v4033_v24 }
 0x1a1   : > { %3799 = vmatpush3.bf16.msra.mxu1 %v4007_v60  ;;  %3580 = vmatprep.subr.bf16.mxu0 %v4036_v26 }
 0x1a2   : > { %3594 = vmatprep.subr.bf16.mxu1 %v4010_v63 }
 0x1a4   : > { %3801 = vmatmul.mubr.bf16.vlgmr.msra.gmra.mrb[16].mxu1 %v874_v54  ;;  %3581 = vmatpush3.bf16.msra.mxu0 %v4037_v28 }
 0x1a5   : > { %3595 = vmatpush3.bf16.msra.mxu1 %v4011_v0  ;;  %3804 = vmatprep.subr.bf16.mxu0 %v4568_v30 }
 0x1a6   : > { %3596 = vmatprep.subr.bf16.mxu1 %v4014_v2 }
 0x1a9   : > { %3597 = vmatpush3.bf16.msra.mxu1 %v4015_v4 }
 0x1aa   : > { %3598 = vmatprep.subr.bf16.mxu1 %v4018_v7 }
 0x1ad   : > { %3599 = vmatpush3.bf16.msra.mxu1 %v4019_v8 }
 0x1ae   : > { %3600 = vmatprep.subr.bf16.mxu1 %v4022_v12 }
 0x1b1   : > { %3601 = vmatpush3.bf16.msra.mxu1 %v4023_v13 }
 0x1b2   : > { %3602 = vmatprep.subr.bf16.mxu1 %v4026_v16 }
 0x1b5   : > { %3603 = vmatpush3.bf16.msra.mxu1 %v4027_v17 }
 0x1b6   : > { %3604 = vmatprep.subr.bf16.mxu1 %v4030_v20 }
 0x1b9   : > { %3605 = vmatpush3.bf16.msra.mxu1 %v4031_v21 }
 0x1ba   : > { %3606 = vmatprep.subr.bf16.mxu1 %v4034_v23 }
 0x1bd   : > { %3607 = vmatpush3.bf16.msra.mxu1 %v4035_v25 }
 0x1be   : > { %3608 = vmatprep.subr.bf16.mxu1 %v4038_v27 }
 0x1c1   : > { %3609 = vmatpush3.bf16.msra.mxu1 %v4039_v29 }
 0x257   : > { %v3516_v31 = vpop.f32.mrb[8].mxu1 }
 0x258   : > { %v3544_v32 = vpop.f32.mrb[12].mxu0  ;;  %v3517_v34 = vpop.f32.mrb[9].mxu1 }
 0x259   : > { %v3518_v35 = vadd.f32 %v3517_v34, %v3516_v31  ;;  %v3545_v36 = vpop.f32.mrb[13].mxu0  ;;  %v3519_v37 = vpop.f32.mrb[10].mxu1 }
 0x25a   : > { %v3546_v38 = vadd.f32 %v3545_v36, %v3544_v32  ;;  %v3547_v39 = vpop.f32.mrb[14].mxu0  ;;  %v3520_v40 = vpop.f32.mrb[11].mxu1 }
 0x25b   : > { %v1239_v41 = vadd.f32 %v3518_v35, %v3225_v33  ;;  %v3521_v42 = vadd.f32 %v3520_v40, %v3519_v37  ;;  %v3548_v43 = vpop.f32.mrb[15].mxu0 }
 0x25c   : > { %v3549_v44 = vadd.f32 %v3548_v43, %v3547_v39 }
 0x25d   : > { %v1242_v45 = vadd.f32 %v3521_v42, %v3225_v33  ;;  %v1288_v46 = vadd.f32 %v3546_v38, %v1239_v41 }
 0x25f   : > { %v3522_v47 = vpop.f32.mrb[12].mxu1  ;;  %v1291_v48 = vadd.f32 %v3549_v44, %v1242_v45 }
 0x260   : > { %v3550_v49 = vpop.f32.mrb[16].mxu0  ;;  %v3523_v10 = vpop.f32.mrb[13].mxu1 }
 0x261   : > { %v3524_v51 = vadd.f32 %v3523_v10, %v3522_v47  ;;  %v3551_v52 = vpop.f32.mrb[17].mxu0  ;;  %v3525_v53 = vpop.f32.mrb[14].mxu1  ;;  %v4041_v10 = vld [vmem:[#allocation5 + $0x388] sm:$0xff]  }
 0x262   : > { %v3552_v54 = vadd.f32 %v3551_v52, %v3550_v49  ;;  %v3553_v55 = vpop.f32.mrb[18].mxu0  ;;  %v3526_v56 = vpop.f32.mrb[15].mxu1 }
 0x263   : > { %v1247_v57 = vadd.f32 %v3524_v51, %v3225_v33  ;;  %v3527_v58 = vadd.f32 %v3526_v56, %v3525_v53  ;;  %v3554_v59 = vpop.f32.mrb[19].mxu0 }
 0x264   : > { %v3555_v60 = vadd.f32 %v3554_v59, %v3553_v55 }
 0x265   : > { %v1250_v61 = vadd.f32 %v3527_v58, %v3225_v33  ;;  %v1296_v62 = vadd.f32 %v3552_v54, %v1247_v57 }
 0x267   : > { %v1299_v63 = vadd.f32 %v3555_v60, %v1250_v61 }
 0x277   : > { %v3802_v0 = vpop.f32.mrb[16].mxu1 }
 0x278   : > { %v1345_v1 = vadd.f32 %v3802_v0, %v1296_v62  ;;  %v1336_v2 = vpop.f32.mrb[17].mxu1  ;;  %v4042_v0 = vld [vmem:[#allocation5 + $0x390] sm:$0xff]  }
 0x279   : > { %v1337_v3 = vadd.f32 %v1336_v2, %v1288_v46  ;;  %v3803_v4 = vpop.f32.mrb[18].mxu1 }
 0x27a   : > { %4136 = vtanh.f32 %v1345_v1  ;;  %v1348_v5 = vadd.f32 %v3803_v4, %v1299_v63  ;;  %v1339_v6 = vpop.f32.mrb[19].mxu1 }
 0x27b   : > { %4138 = vtanh.f32 %v1337_v3  ;;  %v1340_v7 = vadd.f32 %v1339_v6, %v1291_v48 }
 0x27c   : > { %4140 = vtanh.f32 %v1348_v5 }
 0x27d   : > { %4142 = vtanh.f32 %v1340_v7 }
 0x284   : > { %v4137_v8 = vpop.eup %4136 }
 0x285   : > { %v4139_v9 = vpop.eup %4138  ;;  %v4574_v11 = vrot.slane %v4137_v8, 6 }
 0x286   : > { %v4141_v12 = vpop.eup %4140  ;;  %v1359_v13 = vrot.slane %v4139_v9, 6 }
 0x287   : > { %v4143_v14 = vpop.eup %4142  ;;  %v1372_v15 = vsel %vm216_vm0, 0.0, %v4574_v11  ;;  %v1363_v16 = vrot.slane %v4141_v12, 6  ;;  %v4043_v12 = vld [vmem:[#allocation5 + $0x398] sm:$0xff]  }
 0x288   : > { %v1426_v17 = vrot.slane %v1372_v15, 4  ;;  %v1371_v18 = vsel %vm216_vm0, 0.0, %v1359_v13  ;;  %v1360_v19 = vrot.slane %v4143_v14, 6  ;;  %v1384_v20 = vrot.slane %v1372_v15, 1  ;;  %v4045_v14 = vld [vmem:[#allocation5 + $0x3a8] sm:$0xff]  }
 0x289   : > { %v1393_v21 = vrot.slane %v1371_v18, 2  ;;  %v4581_v22 = vsel %vm216_vm0, %v4574_v11, %v1363_v16  ;;  %v1374_v23 = vsel %vm216_vm0, %v1363_v16, 0.0  ;;  %v1379_v24 = vrot.slane %v1371_v18, 1  ;;  %v4047_v16 = vld [vmem:[#allocation5 + $0x3b8] sm:$0xff]  }
 0x28a   : > { %v1427_v25 = vrot.slane %v4581_v22, 4  ;;  %v1429_v26 = vrot.slane %v1374_v23, 4  ;;  %v1361_v27 = vsel %vm216_vm0, %v1359_v13, %v1360_v19  ;;  %v1373_v28 = vsel %vm216_vm0, %v1360_v19, 0.0  ;;  %v4050_v19 = vld [vmem:[#allocation5 + $0x480] sm:$0xff]  }
 0x28b   : > { %v1396_v29 = vrot.slane %v1373_v28, 2  ;;  %v3318_v31 = vpack.c.bf16 %v1361_v27, %v1359_v13  ;;  %v1380_v32 = vrot.slane %v1361_v27, 1  ;;  %v1382_v33 = vrot.slane %v1373_v28, 1  ;;  %v4044_v13 = vld [vmem:[#allocation5 + $0x3a0] sm:$0xff]  }
 0x28c   : > { %v1407_v34 = vrot.slane %v1371_v18, 3  ;;  %v1408_v35 = vrot.slane %v1361_v27, 3  ;;  %v1410_v36 = vrot.slane %v1373_v28, 3  ;;  %v1394_v37 = vrot.slane %v1361_v27, 2 }
 0x28d   : > { %v1381_v38 = vsel %vm237_vm1, %v1379_v24, %v1380_v32  ;;  %v1383_v39 = vsel %vm237_vm1, %v1380_v32, %v1382_v33  ;;  %v1385_v40 = vrot.slane %v4581_v22, 1  ;;  %v1387_v41 = vrot.slane %v1374_v23, 1  ;;  %v4055_v24 = vld [vmem:[#allocation5 + $0x448] sm:$0xff]   ;;  %v4062_v32 = vld [vmem:[#allocation5 + $0x498] sm:$0xff]  }
 0x28e   : > { %v1436_v42 = vpack.c.bf16 %v1383_v39, %v1381_v38  ;;  %v1409_v43 = vsel %vm267_vm2, %v1407_v34, %v1408_v35  ;;  %v1411_v44 = vsel %vm267_vm2, %v1408_v35, %v1410_v36  ;;  %v1395_v45 = vsel %vm252_vm3, %v1393_v21, %v1394_v37  ;;  %v4052_v21 = vld [vmem:[#allocation5 + $0x408] sm:$0xff]   ;;  %v4063_v33 = vld [vmem:[#allocation5 + $0x458] sm:$0xff]   ;;  %v4064_v34 = vld [vmem:[#allocation5 + $0x420] sm:$0xff]  }
 0x28f   : > { %v1438_v46 = vpack.c.bf16 %v1411_v44, %v1409_v43  ;;  %v1397_v47 = vsel %vm252_vm3, %v1394_v37, %v1396_v29  ;;  %v1386_v48 = vsel %vm237_vm1, %v1384_v20, %v1385_v40  ;;  %v1388_v49 = vsel %vm237_vm1, %v1385_v40, %v1387_v41  ;;  %v4051_v20 = vld [vmem:[#allocation5 + $0x440] sm:$0xff]   ;;  %v4060_v29 = vld [vmem:[#allocation5 + $0x418] sm:$0xff]   ;;  %v4068_v38 = vld [vmem:[#allocation5 + $0x428] sm:$0xff]  }
 0x290   : > { %1806 = vmatprep.mubr.bf16.mxu0 %v1436_v42  ;;  %v1437_v51 = vpack.c.bf16 %v1397_v47, %v1395_v45  ;;  %v1441_v52 = vpack.c.bf16 %v1388_v49, %v1386_v48  ;;  %v1412_v53 = vrot.slane %v1372_v15, 3  ;;  %v1413_v54 = vrot.slane %v4581_v22, 3  ;;  %v4065_v35 = vld [vmem:[#allocation5 + $0x3e0] sm:$0xff]   ;;  %v4069_v39 = vld [vmem:[#allocation5 + $0x3e8] sm:$0xff]   ;;  %v4072_v42 = vld [vmem:[#allocation5 + $0x430] sm:$0xff]  }
 0x291   : > { %1855 = vmatprep.mubr.bf16.mxu1 %v1438_v46  ;;  %3319 = vmatmul.mubr.msk.bf16.vlgmr.msra.gmra.mrb[20].mxu0 %vm4492_vm7, %v3318_v31  ;;  %v1415_v55 = vrot.slane %v1374_v23, 3  ;;  %v3322_v56 = vpack.c.bf16 %v4581_v22, %v4574_v11  ;;  %v1398_v57 = vrot.slane %v1372_v15, 2  ;;  %v1399_v58 = vrot.slane %v4581_v22, 2  ;;  %v4046_v15 = vld [vmem:[#allocation5 + $0x3b0] sm:$0xff]   ;;  %v4054_v22 = vld [vmem:[#allocation5 + $0x488] sm:$0xff]   ;;  %v4061_v31 = vld [vmem:[#allocation5 + $0x3d8] sm:$0xff]  }
 0x292   : > { %1856 = vmatmul.mubr.bf16.vlgmr.msra.gmra.mrb[20].mxu1 %v1437_v51  ;;  %3805 = vmatpush3.bf16.msra.mxu0 %v4568_v30  ;;  %v1414_v59 = vsel %vm267_vm2, %v1412_v53, %v1413_v54  ;;  %v1401_v60 = vrot.slane %v1374_v23, 2  ;;  %v1421_v61 = vrot.slane %v1371_v18, 4  ;;  %v1422_v62 = vrot.slane %v1361_v27, 4  ;;  %v4049_v18 = vld [vmem:[#allocation5 + $0x3c0] sm:$0xff]   ;;  %v4053_v23 = vld [vmem:[#allocation5 + $0x3c8] sm:$0xff]   ;;  %v4058_v27 = vld [vmem:[#allocation5 + $0x490] sm:$0xff]  }
 0x293   : > { %1814 = vmatprep.mubr.bf16.mxu0 %v1441_v52  ;;  %v1416_v63 = vsel %vm267_vm2, %v1413_v54, %v1415_v55  ;;  %3806 = vmatprep.subr.bf16.mxu0 %v4041_v10  ;;  %v1400_v1 = vsel %vm252_vm3, %v1398_v57, %v1399_v58  ;;  %v1424_v2 = vrot.slane %v1373_v28, 4  ;;  %v1428_v3 = vsel %vm282_vm5, %v1426_v17, %v1427_v25  ;;  %v4048_v17 = vld [vmem:[#allocation5 + $0x400] sm:$0xff]   ;;  %v4059_v28 = vld [vmem:[#allocation5 + $0x450] sm:$0xff]   ;;  %v4070_v40 = vld [vmem:[#allocation5 + $0x4a8] sm:$0xff]  }
 0x294   : > { %v1443_v4 = vpack.c.bf16 %v1416_v63, %v1414_v59  ;;  %v1402_v5 = vsel %vm252_vm3, %v1399_v58, %v1401_v60  ;;  %v1423_v30 = vsel %vm282_vm5, %v1421_v61, %v1422_v62  ;;  %v1430_v6 = vsel %vm282_vm5, %v1427_v25, %v1429_v26  ;;  %3632 = vmatprep.subr.bf16.mxu1 %v4048_v17  ;;  %v4056_v25 = vld [vmem:[#allocation5 + $0x410] sm:$0xff]   ;;  %v4066_v36 = vld [vmem:[#allocation5 + $0x4a0] sm:$0xff]   ;;  %v4071_v41 = vld [vmem:[#allocation5 + $0x468] sm:$0xff]  }
 0x295   : > { %v1442_v7 = vpack.c.bf16 %v1402_v5, %v1400_v1  ;;  %v1425_v8 = vsel %vm282_vm5, %v1422_v62, %v1424_v2  ;;  %v1444_v9 = vpack.c.bf16 %v1430_v6, %v1428_v3  ;;  %3633 = vmatpush3.bf16.msra.mxu1 %v4049_v18  ;;  %v4057_v26 = vld [vmem:[#allocation5 + $0x3d0] sm:$0xff]   ;;  %v4067_v37 = vld [vmem:[#allocation5 + $0x460] sm:$0xff]   ;;  %v4076_v46 = vld [vmem:[#allocation5 + $0x438] sm:$0xff]  }
 0x296   : > { %1863 = vmatprep.mubr.bf16.mxu1 %v1443_v4  ;;  %3807 = vmatpush3.bf16.msra.mxu0 %v4041_v10  ;;  %v1439_v11 = vpack.c.bf16 %v1425_v8, %v1423_v30  ;;  %v4074_v43 = vld [vmem:[#allocation5 + $0x4b0] sm:$0xff]   ;;  %v4078_v47 = vld [vmem:[#allocation5 + $0x4b8] sm:$0xff]   ;;  %v4613_v10 = vld [vmem:[#allocation5 + $0x4c0] sm:$0xff]  }
 0x297   : > { %3808 = vmatprep.subr.bf16.mxu0 %v4042_v0  ;;  %3634 = vmatprep.subr.bf16.mxu1 %v4052_v21  ;;  %v4073_v44 = vld [vmem:[#allocation5 + $0x3f0] sm:$0xff]   ;;  %v4077_v48 = vld [vmem:[#allocation5 + $0x3f8] sm:$0xff]   ;;  %v3275_v53 = vld [vmem:[%s4760_s2 + $0x2] ss:$0 sm:$0xff] }
 0x298   : > { %v4075_v45 = vld [vmem:[#allocation5 + $0x470] sm:$0xff]   ;;  %v4079_v49 = vld [vmem:[#allocation5 + $0x478] sm:$0xff]  }
 0x299   : > { %3323 = vmatmul.mubr.msk.bf16.gmra.mrb[24].mxu0 %vm4492_vm7, %v3322_v56  ;;  %3635 = vmatpush3.bf16.msra.mxu1 %v4053_v23 }
 0x29a   : > { %1864 = vmatmul.mubr.bf16.gmra.mrb[24].mxu1 %v1442_v7  ;;  %3809 = vmatpush3.bf16.msra.mxu0 %v4042_v0 }
 0x29b   : > { %3820 = vmatprep.mubr.bf16.mxu0 %v1439_v11  ;;  %3810 = vmatprep.subr.bf16.mxu0 %v4043_v12 }
 0x29c   : > { %3636 = vmatprep.subr.bf16.mxu1 %v4056_v25 }
 0x29d   : > { %3637 = vmatpush3.bf16.msra.mxu1 %v4057_v26 }
 0x29e   : > { %3811 = vmatpush3.bf16.msra.mxu0 %v4043_v12  ;;  %3638 = vmatprep.subr.bf16.mxu1 %v4060_v29 }
 0x29f   : > { %3812 = vmatprep.subr.bf16.mxu0 %v4044_v13 }
 0x2a1   : > { %3639 = vmatpush3.bf16.msra.mxu1 %v4061_v31 }
 0x2a2   : > { %3813 = vmatpush3.bf16.msra.mxu0 %v4044_v13  ;;  %3640 = vmatprep.subr.bf16.mxu1 %v4064_v34 }
 0x2a3   : > { %3814 = vmatprep.subr.bf16.mxu0 %v4045_v14 }
 0x2a5   : > { %3641 = vmatpush3.bf16.msra.mxu1 %v4065_v35 }
 0x2a6   : > { %3815 = vmatpush3.bf16.msra.mxu0 %v4045_v14  ;;  %3642 = vmatprep.subr.bf16.mxu1 %v4068_v38 }
 0x2a7   : > { %3816 = vmatprep.subr.bf16.mxu0 %v4046_v15 }
 0x2a9   : > { %3643 = vmatpush3.bf16.msra.mxu1 %v4069_v39 }
 0x2aa   : > { %3817 = vmatpush3.bf16.msra.mxu0 %v4046_v15  ;;  %3644 = vmatprep.subr.bf16.mxu1 %v4072_v42 }
 0x2ab   : > { %3818 = vmatprep.subr.bf16.mxu0 %v4047_v16 }
 0x2ad   : > { %3645 = vmatpush3.bf16.msra.mxu1 %v4073_v44 }
 0x2ae   : > { %3819 = vmatpush3.bf16.msra.mxu0 %v4047_v16  ;;  %3646 = vmatprep.subr.bf16.mxu1 %v4076_v46 }
 0x2af   : > { %3660 = vmatprep.subr.bf16.mxu0 %v4050_v19 }
 0x2b1   : > { %3821 = vmatmul.mubr.bf16.vlgmr.msra.gmra.mrb[28].mxu0 %v1444_v9  ;;  %3647 = vmatpush3.bf16.msra.mxu1 %v4077_v48 }
 0x2b2   : > { %3661 = vmatpush3.bf16.msra.mxu0 %v4051_v20  ;;  %3824 = vmatprep.subr.bf16.mxu1 %v4613_v10 }
 0x2b3   : > { %3662 = vmatprep.subr.bf16.mxu0 %v4054_v22 }
 0x2b6   : > { %3663 = vmatpush3.bf16.msra.mxu0 %v4055_v24 }
 0x2b7   : > { %3664 = vmatprep.subr.bf16.mxu0 %v4058_v27 }
 0x2ba   : > { %3665 = vmatpush3.bf16.msra.mxu0 %v4059_v28 }
 0x2bb   : > { %3666 = vmatprep.subr.bf16.mxu0 %v4062_v32 }
 0x2be   : > { %3667 = vmatpush3.bf16.msra.mxu0 %v4063_v33 }
 0x2bf   : > { %3668 = vmatprep.subr.bf16.mxu0 %v4066_v36 }
 0x2c2   : > { %3669 = vmatpush3.bf16.msra.mxu0 %v4067_v37 }
 0x2c3   : > { %3670 = vmatprep.subr.bf16.mxu0 %v4070_v40 }
 0x2c6   : > { %3671 = vmatpush3.bf16.msra.mxu0 %v4071_v41 }
 0x2c7   : > { %3672 = vmatprep.subr.bf16.mxu0 %v4074_v43 }
 0x2ca   : > { %3673 = vmatpush3.bf16.msra.mxu0 %v4075_v45 }
 0x2cb   : > { %3674 = vmatprep.subr.bf16.mxu0 %v4078_v47 }
 0x2ce   : > { %3675 = vmatpush3.bf16.msra.mxu0 %v4079_v49 }
 0x364   : > { %v3582_v51 = vpop.f32.mrb[20].mxu0 }
 0x365   : > { %v3610_v52 = vpop.f32.mrb[20].mxu1  ;;  %v3583_v54 = vpop.f32.mrb[21].mxu0 }
 0x366   : > { %v3584_v55 = vadd.f32 %v3583_v54, %v3582_v51  ;;  %v3611_v56 = vpop.f32.mrb[21].mxu1  ;;  %v3585_v57 = vpop.f32.mrb[22].mxu0 }
 0x367   : > { %v3612_v58 = vadd.f32 %v3611_v56, %v3610_v52  ;;  %v3613_v59 = vpop.f32.mrb[22].mxu1  ;;  %v3586_v60 = vpop.f32.mrb[23].mxu0 }
 0x368   : > { %v1809_v61 = vadd.f32 %v3584_v55, %v3275_v53  ;;  %v3587_v62 = vadd.f32 %v3586_v60, %v3585_v57  ;;  %v3614_v63 = vpop.f32.mrb[23].mxu1 }
 0x369   : > { %v3615_v0 = vadd.f32 %v3614_v63, %v3613_v59 }
 0x36a   : > { %v1812_v1 = vadd.f32 %v3587_v62, %v3275_v53  ;;  %v1858_v2 = vadd.f32 %v3612_v58, %v1809_v61 }
 0x36c   : > { %v3588_v3 = vpop.f32.mrb[24].mxu0  ;;  %v1861_v4 = vadd.f32 %v3615_v0, %v1812_v1 }
 0x36d   : > { %v3616_v5 = vpop.f32.mrb[24].mxu1  ;;  %v3589_v30 = vpop.f32.mrb[25].mxu0 }
 0x36e   : > { %v3590_v6 = vadd.f32 %v3589_v30, %v3588_v3  ;;  %v3617_v7 = vpop.f32.mrb[25].mxu1  ;;  %v3591_v8 = vpop.f32.mrb[26].mxu0  ;;  %v4081_v30 = vld [vmem:[#allocation5 + $0x4c8] sm:$0xff]  }
 0x36f   : > { %v3618_v9 = vadd.f32 %v3617_v7, %v3616_v5  ;;  %v3619_v11 = vpop.f32.mrb[26].mxu1  ;;  %v3592_v12 = vpop.f32.mrb[27].mxu0 }
 0x370   : > { %v1817_v13 = vadd.f32 %v3590_v6, %v3275_v53  ;;  %v3593_v14 = vadd.f32 %v3592_v12, %v3591_v8  ;;  %v3620_v15 = vpop.f32.mrb[27].mxu1 }
 0x371   : > { %v3621_v16 = vadd.f32 %v3620_v15, %v3619_v11 }
 0x372   : > { %v1820_v17 = vadd.f32 %v3593_v14, %v3275_v53  ;;  %v1866_v18 = vadd.f32 %v3618_v9, %v1817_v13 }
 0x374   : > { %v1869_v19 = vadd.f32 %v3621_v16, %v1820_v17 }
 0x384   : > { %v3822_v20 = vpop.f32.mrb[28].mxu0 }
 0x385   : > { %v1915_v21 = vadd.f32 %v3822_v20, %v1866_v18  ;;  %v1906_v22 = vpop.f32.mrb[29].mxu0  ;;  %v4082_v20 = vld [vmem:[#allocation5 + $0x4d0] sm:$0xff]  }
 0x386   : > { %v1907_v23 = vadd.f32 %v1906_v22, %v1858_v2  ;;  %v3823_v24 = vpop.f32.mrb[30].mxu0 }
 0x387   : > { %4144 = vtanh.f32 %v1915_v21  ;;  %v1918_v25 = vadd.f32 %v3823_v24, %v1869_v19  ;;  %v1909_v26 = vpop.f32.mrb[31].mxu0 }
 0x388   : > { %4146 = vtanh.f32 %v1907_v23  ;;  %v1910_v27 = vadd.f32 %v1909_v26, %v1861_v4 }
 0x389   : > { %4148 = vtanh.f32 %v1918_v25 }
 0x38a   : > { %4150 = vtanh.f32 %v1910_v27 }
 0x391   : > { %v4145_v28 = vpop.eup %4144 }
 0x392   : > { %v4147_v29 = vpop.eup %4146  ;;  %v4619_v31 = vrot.slane %v4145_v28, 6 }
 0x393   : > { %v4149_v32 = vpop.eup %4148  ;;  %v1929_v33 = vrot.slane %v4147_v29, 6 }
 0x394   : > { %v4151_v34 = vpop.eup %4150  ;;  %v1942_v35 = vsel %vm216_vm0, 0.0, %v4619_v31  ;;  %v1933_v36 = vrot.slane %v4149_v32, 6  ;;  %v4083_v32 = vld [vmem:[#allocation5 + $0x4d8] sm:$0xff]  }
 0x395   : > { %v1996_v37 = vrot.slane %v1942_v35, 4  ;;  %v1941_v38 = vsel %vm216_vm0, 0.0, %v1929_v33  ;;  %v1930_v39 = vrot.slane %v4151_v34, 6  ;;  %v1954_v40 = vrot.slane %v1942_v35, 1  ;;  %v4085_v34 = vld [vmem:[#allocation5 + $0x4e8] sm:$0xff]  }
 0x396   : > { %v1963_v41 = vrot.slane %v1941_v38, 2  ;;  %v4626_v42 = vsel %vm216_vm0, %v4619_v31, %v1933_v36  ;;  %v1944_v43 = vsel %vm216_vm0, %v1933_v36, 0.0  ;;  %v1949_v44 = vrot.slane %v1941_v38, 1  ;;  %v4087_v36 = vld [vmem:[#allocation5 + $0x4f8] sm:$0xff]  }
 0x397   : > { %v1997_v45 = vrot.slane %v4626_v42, 4  ;;  %v1999_v46 = vrot.slane %v1944_v43, 4  ;;  %v1931_v47 = vsel %vm216_vm0, %v1929_v33, %v1930_v39  ;;  %v1943_v48 = vsel %vm216_vm0, %v1930_v39, 0.0  ;;  %v4090_v39 = vld [vmem:[#allocation5 + $0x5c0] sm:$0xff]  }
 0x398   : > { %v1966_v49 = vrot.slane %v1943_v48, 2  ;;  %v3368_v51 = vpack.c.bf16 %v1931_v47, %v1929_v33  ;;  %v1950_v52 = vrot.slane %v1931_v47, 1  ;;  %v1952_v53 = vrot.slane %v1943_v48, 1  ;;  %v4084_v33 = vld [vmem:[#allocation5 + $0x4e0] sm:$0xff]  }
 0x399   : > { %v1977_v54 = vrot.slane %v1941_v38, 3  ;;  %v1978_v55 = vrot.slane %v1931_v47, 3  ;;  %v1980_v56 = vrot.slane %v1943_v48, 3  ;;  %v1964_v57 = vrot.slane %v1931_v47, 2 }
 0x39a   : > { %v1951_v58 = vsel %vm237_vm1, %v1949_v44, %v1950_v52  ;;  %v1953_v59 = vsel %vm237_vm1, %v1950_v52, %v1952_v53  ;;  %v1955_v60 = vrot.slane %v4626_v42, 1  ;;  %v1957_v61 = vrot.slane %v1944_v43, 1  ;;  %v4095_v44 = vld [vmem:[#allocation5 + $0x588] sm:$0xff]   ;;  %v4102_v52 = vld [vmem:[#allocation5 + $0x5d8] sm:$0xff]  }
 0x39b   : > { %v2006_v62 = vpack.c.bf16 %v1953_v59, %v1951_v58  ;;  %v1979_v63 = vsel %vm267_vm2, %v1977_v54, %v1978_v55  ;;  %v1981_v0 = vsel %vm267_vm2, %v1978_v55, %v1980_v56  ;;  %v1965_v1 = vsel %vm252_vm3, %v1963_v41, %v1964_v57  ;;  %v4092_v41 = vld [vmem:[#allocation5 + $0x548] sm:$0xff]   ;;  %v4103_v53 = vld [vmem:[#allocation5 + $0x598] sm:$0xff]   ;;  %v4104_v54 = vld [vmem:[#allocation5 + $0x560] sm:$0xff]  }
 0x39c   : > { %v2008_v2 = vpack.c.bf16 %v1981_v0, %v1979_v63  ;;  %v1967_v3 = vsel %vm252_vm3, %v1964_v57, %v1966_v49  ;;  %v1956_v4 = vsel %vm237_vm1, %v1954_v40, %v1955_v60  ;;  %v1958_v5 = vsel %vm237_vm1, %v1955_v60, %v1957_v61  ;;  %v4091_v40 = vld [vmem:[#allocation5 + $0x580] sm:$0xff]   ;;  %v4100_v49 = vld [vmem:[#allocation5 + $0x558] sm:$0xff]   ;;  %v4108_v58 = vld [vmem:[#allocation5 + $0x568] sm:$0xff]  }
 0x39d   : > { %2376 = vmatprep.mubr.bf16.mxu1 %v2006_v62  ;;  %v2007_v6 = vpack.c.bf16 %v1967_v3, %v1965_v1  ;;  %v2011_v7 = vpack.c.bf16 %v1958_v5, %v1956_v4  ;;  %v1982_v8 = vrot.slane %v1942_v35, 3  ;;  %v1983_v9 = vrot.slane %v4626_v42, 3  ;;  %v4105_v55 = vld [vmem:[#allocation5 + $0x520] sm:$0xff]   ;;  %v4109_v59 = vld [vmem:[#allocation5 + $0x528] sm:$0xff]   ;;  %v4112_v62 = vld [vmem:[#allocation5 + $0x570] sm:$0xff]  }
 0x39e   : > { %2425 = vmatprep.mubr.bf16.mxu0 %v2008_v2  ;;  %3369 = vmatmul.mubr.msk.bf16.vlgmr.msra.gmra.mrb[28].mxu1 %vm4492_vm7, %v3368_v51  ;;  %v1985_v11 = vrot.slane %v1944_v43, 3  ;;  %v3372_v12 = vpack.c.bf16 %v4626_v42, %v4619_v31  ;;  %v1968_v13 = vrot.slane %v1942_v35, 2  ;;  %v1969_v14 = vrot.slane %v4626_v42, 2  ;;  %v4086_v35 = vld [vmem:[#allocation5 + $0x4f0] sm:$0xff]   ;;  %v4094_v42 = vld [vmem:[#allocation5 + $0x5c8] sm:$0xff]   ;;  %v4101_v51 = vld [vmem:[#allocation5 + $0x518] sm:$0xff]  }
 0x39f   : > { %2426 = vmatmul.mubr.bf16.vlgmr.msra.gmra.mrb[32].mxu0 %v2007_v6  ;;  %3825 = vmatpush3.bf16.msra.mxu1 %v4613_v10  ;;  %v1984_v15 = vsel %vm267_vm2, %v1982_v8, %v1983_v9  ;;  %v1971_v16 = vrot.slane %v1944_v43, 2  ;;  %v1991_v17 = vrot.slane %v1941_v38, 4  ;;  %v1992_v18 = vrot.slane %v1931_v47, 4  ;;  %v4089_v38 = vld [vmem:[#allocation5 + $0x500] sm:$0xff]   ;;  %v4093_v43 = vld [vmem:[#allocation5 + $0x508] sm:$0xff]   ;;  %v4098_v47 = vld [vmem:[#allocation5 + $0x5d0] sm:$0xff]  }
 0x3a0   : > { %2384 = vmatprep.mubr.bf16.mxu1 %v2011_v7  ;;  %v1986_v19 = vsel %vm267_vm2, %v1983_v9, %v1985_v11  ;;  %3826 = vmatprep.subr.bf16.mxu1 %v4081_v30  ;;  %v1970_v21 = vsel %vm252_vm3, %v1968_v13, %v1969_v14  ;;  %v1994_v22 = vrot.slane %v1943_v48, 4  ;;  %v1998_v23 = vsel %vm282_vm5, %v1996_v37, %v1997_v45  ;;  %v4088_v37 = vld [vmem:[#allocation5 + $0x540] sm:$0xff]   ;;  %v4099_v48 = vld [vmem:[#allocation5 + $0x590] sm:$0xff]   ;;  %v4110_v60 = vld [vmem:[#allocation5 + $0x5e8] sm:$0xff]  }
 0x3a1   : > { %v2013_v24 = vpack.c.bf16 %v1986_v19, %v1984_v15  ;;  %v1972_v25 = vsel %vm252_vm3, %v1969_v14, %v1971_v16  ;;  %v1993_v10 = vsel %vm282_vm5, %v1991_v17, %v1992_v18  ;;  %v2000_v26 = vsel %vm282_vm5, %v1997_v45, %v1999_v46  ;;  %3698 = vmatprep.subr.bf16.mxu0 %v4088_v37  ;;  %v4096_v45 = vld [vmem:[#allocation5 + $0x550] sm:$0xff]   ;;  %v4106_v56 = vld [vmem:[#allocation5 + $0x5e0] sm:$0xff]   ;;  %v4111_v61 = vld [vmem:[#allocation5 + $0x5a8] sm:$0xff]  }
 0x3a2   : > { %v2012_v27 = vpack.c.bf16 %v1972_v25, %v1970_v21  ;;  %v1995_v28 = vsel %vm282_vm5, %v1992_v18, %v1994_v22  ;;  %v2014_v29 = vpack.c.bf16 %v2000_v26, %v1998_v23  ;;  %3699 = vmatpush3.bf16.msra.mxu0 %v4089_v38  ;;  %v4097_v46 = vld [vmem:[#allocation5 + $0x510] sm:$0xff]   ;;  %v4107_v57 = vld [vmem:[#allocation5 + $0x5a0] sm:$0xff]   ;;  %v4116_v2 = vld [vmem:[#allocation5 + $0x578] sm:$0xff]  }
 0x3a3   : > { %2433 = vmatprep.mubr.bf16.mxu0 %v2013_v24  ;;  %3827 = vmatpush3.bf16.msra.mxu1 %v4081_v30  ;;  %v2009_v31 = vpack.c.bf16 %v1995_v28, %v1993_v10  ;;  %v4114_v63 = vld [vmem:[#allocation5 + $0x5f0] sm:$0xff]   ;;  %v4118_v3 = vld [vmem:[#allocation5 + $0x5f8] sm:$0xff]   ;;  %v4658_v30 = vld [vmem:[#allocation5 + $0x600] sm:$0xff]  }
 0x3a4   : > { %3828 = vmatprep.subr.bf16.mxu1 %v4082_v20  ;;  %3700 = vmatprep.subr.bf16.mxu0 %v4092_v41  ;;  %v4113_v0 = vld [vmem:[#allocation5 + $0x530] sm:$0xff]   ;;  %v4117_v4 = vld [vmem:[#allocation5 + $0x538] sm:$0xff]   ;;  %v3325_v8 = vld [vmem:[%s4760_s2 + $0x3] ss:$0 sm:$0xff] }
 0x3a5   : > { %v4115_v1 = vld [vmem:[#allocation5 + $0x5b0] sm:$0xff]   ;;  %v4119_v5 = vld [vmem:[#allocation5 + $0x5b8] sm:$0xff]  }
 0x3a6   : > { %3373 = vmatmul.mubr.msk.bf16.gmra.mrb[32].mxu1 %vm4492_vm7, %v3372_v12  ;;  %3701 = vmatpush3.bf16.msra.mxu0 %v4093_v43 }
 0x3a7   : > { %2434 = vmatmul.mubr.bf16.gmra.mrb[36].mxu0 %v2012_v27  ;;  %3829 = vmatpush3.bf16.msra.mxu1 %v4082_v20 }
 0x3a8   : > { %3840 = vmatprep.mubr.bf16.mxu1 %v2009_v31  ;;  %3830 = vmatprep.subr.bf16.mxu1 %v4083_v32 }
 0x3a9   : > { %3702 = vmatprep.subr.bf16.mxu0 %v4096_v45 }
 0x3aa   : > { %3703 = vmatpush3.bf16.msra.mxu0 %v4097_v46 }
 0x3ab   : > { %3831 = vmatpush3.bf16.msra.mxu1 %v4083_v32  ;;  %3704 = vmatprep.subr.bf16.mxu0 %v4100_v49 }
 0x3ac   : > { %3832 = vmatprep.subr.bf16.mxu1 %v4084_v33 }
 0x3ae   : > { %3705 = vmatpush3.bf16.msra.mxu0 %v4101_v51 }
 0x3af   : > { %3833 = vmatpush3.bf16.msra.mxu1 %v4084_v33  ;;  %3706 = vmatprep.subr.bf16.mxu0 %v4104_v54 }
 0x3b0   : > { %3834 = vmatprep.subr.bf16.mxu1 %v4085_v34 }
 0x3b2   : > { %3707 = vmatpush3.bf16.msra.mxu0 %v4105_v55 }
 0x3b3   : > { %3835 = vmatpush3.bf16.msra.mxu1 %v4085_v34  ;;  %3708 = vmatprep.subr.bf16.mxu0 %v4108_v58 }
 0x3b4   : > { %3836 = vmatprep.subr.bf16.mxu1 %v4086_v35 }
 0x3b6   : > { %3709 = vmatpush3.bf16.msra.mxu0 %v4109_v59 }
 0x3b7   : > { %3837 = vmatpush3.bf16.msra.mxu1 %v4086_v35  ;;  %3710 = vmatprep.subr.bf16.mxu0 %v4112_v62 }
 0x3b8   : > { %3838 = vmatprep.subr.bf16.mxu1 %v4087_v36 }
 0x3ba   : > { %3711 = vmatpush3.bf16.msra.mxu0 %v4113_v0 }
 0x3bb   : > { %3839 = vmatpush3.bf16.msra.mxu1 %v4087_v36  ;;  %3712 = vmatprep.subr.bf16.mxu0 %v4116_v2 }
 0x3bc   : > { %3726 = vmatprep.subr.bf16.mxu1 %v4090_v39 }
 0x3be   : > { %3841 = vmatmul.mubr.bf16.vlgmr.msra.gmra.mrb[36].mxu1 %v2014_v29  ;;  %3713 = vmatpush3.bf16.msra.mxu0 %v4117_v4 }
 0x3bf   : > { %3727 = vmatpush3.bf16.msra.mxu1 %v4091_v40  ;;  %3844 = vmatprep.subr.bf16.mxu0 %v4658_v30 }
 0x3c0   : > { %3728 = vmatprep.subr.bf16.mxu1 %v4094_v42 }
 0x3c3   : > { %3729 = vmatpush3.bf16.msra.mxu1 %v4095_v44 }
 0x3c4   : > { %3730 = vmatprep.subr.bf16.mxu1 %v4098_v47 }
 0x3c7   : > { %3731 = vmatpush3.bf16.msra.mxu1 %v4099_v48 }
 0x3c8   : > { %3732 = vmatprep.subr.bf16.mxu1 %v4102_v52 }
 0x3cb   : > { %3733 = vmatpush3.bf16.msra.mxu1 %v4103_v53 }
 0x3cc   : > { %3734 = vmatprep.subr.bf16.mxu1 %v4106_v56 }
 0x3cf   : > { %3735 = vmatpush3.bf16.msra.mxu1 %v4107_v57 }
 0x3d0   : > { %3736 = vmatprep.subr.bf16.mxu1 %v4110_v60 }
 0x3d3   : > { %3737 = vmatpush3.bf16.msra.mxu1 %v4111_v61 }
 0x3d4   : > { %3738 = vmatprep.subr.bf16.mxu1 %v4114_v63 }
 0x3d7   : > { %3739 = vmatpush3.bf16.msra.mxu1 %v4115_v1 }
 0x3d8   : > { %3740 = vmatprep.subr.bf16.mxu1 %v4118_v3 }
 0x3db   : > { %3741 = vmatpush3.bf16.msra.mxu1 %v4119_v5 }
 0x471   : > { %v3648_v6 = vpop.f32.mrb[28].mxu1 }
 0x472   : > { %v3676_v7 = vpop.f32.mrb[32].mxu0  ;;  %v3649_v9 = vpop.f32.mrb[29].mxu1 }
 0x473   : > { %v3650_v11 = vadd.f32 %v3649_v9, %v3648_v6  ;;  %v3677_v12 = vpop.f32.mrb[33].mxu0  ;;  %v3651_v13 = vpop.f32.mrb[30].mxu1 }
 0x474   : > { %v3678_v14 = vadd.f32 %v3677_v12, %v3676_v7  ;;  %v3679_v15 = vpop.f32.mrb[34].mxu0  ;;  %v3652_v16 = vpop.f32.mrb[31].mxu1 }
 0x475   : > { %v2379_v17 = vadd.f32 %v3650_v11, %v3325_v8  ;;  %v3653_v18 = vadd.f32 %v3652_v16, %v3651_v13  ;;  %v3680_v19 = vpop.f32.mrb[35].mxu0 }
 0x476   : > { %v3681_v20 = vadd.f32 %v3680_v19, %v3679_v15 }
 0x477   : > { %v2382_v21 = vadd.f32 %v3653_v18, %v3325_v8  ;;  %v2428_v22 = vadd.f32 %v3678_v14, %v2379_v17 }
 0x479   : > { %v3654_v23 = vpop.f32.mrb[32].mxu1  ;;  %v2431_v24 = vadd.f32 %v3681_v20, %v2382_v21 }
 0x47a   : > { %v3682_v25 = vpop.f32.mrb[36].mxu0  ;;  %v3655_v10 = vpop.f32.mrb[33].mxu1 }
 0x47b   : > { %v3656_v26 = vadd.f32 %v3655_v10, %v3654_v23  ;;  %v3683_v27 = vpop.f32.mrb[37].mxu0  ;;  %v3657_v28 = vpop.f32.mrb[34].mxu1  ;;  %v4121_v10 = vld [vmem:[#allocation5 + $0x608] sm:$0xff]  }
 0x47c   : > { %v3684_v29 = vadd.f32 %v3683_v27, %v3682_v25  ;;  %v3685_v31 = vpop.f32.mrb[38].mxu0  ;;  %v3658_v32 = vpop.f32.mrb[35].mxu1 }
 0x47d   : > { %v2387_v33 = vadd.f32 %v3656_v26, %v3325_v8  ;;  %v3659_v34 = vadd.f32 %v3658_v32, %v3657_v28  ;;  %v3686_v35 = vpop.f32.mrb[39].mxu0 }
 0x47e   : > { %v3687_v36 = vadd.f32 %v3686_v35, %v3685_v31 }
 0x47f   : > { %v2390_v37 = vadd.f32 %v3659_v34, %v3325_v8  ;;  %v2436_v38 = vadd.f32 %v3684_v29, %v2387_v33 }
 0x481   : > { %v2439_v39 = vadd.f32 %v3687_v36, %v2390_v37 }
 0x491   : > { %v3842_v40 = vpop.f32.mrb[36].mxu1 }
 0x492   : > { %v2485_v41 = vadd.f32 %v3842_v40, %v2436_v38  ;;  %v2476_v42 = vpop.f32.mrb[37].mxu1  ;;  %v4122_v40 = vld [vmem:[#allocation5 + $0x610] sm:$0xff]  }
 0x493   : > { %v2477_v43 = vadd.f32 %v2476_v42, %v2428_v22  ;;  %v3843_v44 = vpop.f32.mrb[38].mxu1 }
 0x494   : > { %4152 = vtanh.f32 %v2485_v41  ;;  %v2488_v45 = vadd.f32 %v3843_v44, %v2439_v39  ;;  %v2479_v46 = vpop.f32.mrb[39].mxu1 }
 0x495   : > { %4154 = vtanh.f32 %v2477_v43  ;;  %v2480_v47 = vadd.f32 %v2479_v46, %v2431_v24 }
 0x496   : > { %4156 = vtanh.f32 %v2488_v45 }
 0x497   : > { %4158 = vtanh.f32 %v2480_v47 }
 0x49e   : > { %v4153_v48 = vpop.eup %4152 }
 0x49f   : > { %v4155_v49 = vpop.eup %4154  ;;  %v4664_v51 = vrot.slane %v4153_v48, 6 }
 0x4a0   : > { %v4157_v52 = vpop.eup %4156  ;;  %v2499_v53 = vrot.slane %v4155_v49, 6 }
 0x4a1   : > { %v4159_v54 = vpop.eup %4158  ;;  %v2512_v55 = vsel %vm216_vm0, 0.0, %v4664_v51  ;;  %v2503_v56 = vrot.slane %v4157_v52, 6  ;;  %v4123_v52 = vld [vmem:[#allocation5 + $0x618] sm:$0xff]  }
 0x4a2   : > { %v2566_v57 = vrot.slane %v2512_v55, 4  ;;  %v2511_v58 = vsel %vm216_vm0, 0.0, %v2499_v53  ;;  %v2500_v59 = vrot.slane %v4159_v54, 6  ;;  %v2524_v60 = vrot.slane %v2512_v55, 1  ;;  %v4125_v54 = vld [vmem:[#allocation5 + $0x628] sm:$0xff]  }
 0x4a3   : > { %v2533_v61 = vrot.slane %v2511_v58, 2  ;;  %v4671_v62 = vsel %vm216_vm0, %v4664_v51, %v2503_v56  ;;  %v2514_v63 = vsel %vm216_vm0, %v2503_v56, 0.0  ;;  %v2519_v0 = vrot.slane %v2511_v58, 1  ;;  %v4127_v56 = vld [vmem:[#allocation5 + $0x638] sm:$0xff]  }
 0x4a4   : > { %v2567_v1 = vrot.slane %v4671_v62, 4  ;;  %v2569_v2 = vrot.slane %v2514_v63, 4  ;;  %v2501_v3 = vsel %vm216_vm0, %v2499_v53, %v2500_v59  ;;  %v2513_v4 = vsel %vm216_vm0, %v2500_v59, 0.0 }
 0x4a5   : > { %v2536_v5 = vrot.slane %v2513_v4, 2  ;;  %v3418_v6 = vpack.c.bf16 %v2501_v3, %v2499_v53  ;;  %v2520_v7 = vrot.slane %v2501_v3, 1  ;;  %v2522_v8 = vrot.slane %v2513_v4, 1  ;;  %v4124_v53 = vld [vmem:[#allocation5 + $0x620] sm:$0xff]  }
 0x4a6   : > { %v2547_v9 = vrot.slane %v2511_v58, 3  ;;  %v2548_v11 = vrot.slane %v2501_v3, 3  ;;  %v2550_v12 = vrot.slane %v2513_v4, 3  ;;  %v2534_v13 = vrot.slane %v2501_v3, 2 }
 0x4a7   : > { %v2521_v14 = vsel %vm237_vm1, %v2519_v0, %v2520_v7  ;;  %v2523_v15 = vsel %vm237_vm1, %v2520_v7, %v2522_v8  ;;  %v2525_v16 = vrot.slane %v4671_v62, 1  ;;  %v2527_v17 = vrot.slane %v2514_v63, 1 }
 0x4a8   : > { %v2576_v18 = vpack.c.bf16 %v2523_v15, %v2521_v14  ;;  %v2549_v19 = vsel %vm267_vm2, %v2547_v9, %v2548_v11  ;;  %v2551_v20 = vsel %vm267_vm2, %v2548_v11, %v2550_v12  ;;  %v2535_v21 = vsel %vm252_vm3, %v2533_v61, %v2534_v13 }
 0x4a9   : > { %v2578_v22 = vpack.c.bf16 %v2551_v20, %v2549_v19  ;;  %v2537_v23 = vsel %vm252_vm3, %v2534_v13, %v2536_v5  ;;  %v2526_v24 = vsel %vm237_vm1, %v2524_v60, %v2525_v16  ;;  %v2528_v25 = vsel %vm237_vm1, %v2525_v16, %v2527_v17 }
 0x4aa   : > { %2946 = vmatprep.mubr.bf16.mxu0 %v2576_v18  ;;  %v2577_v26 = vpack.c.bf16 %v2537_v23, %v2535_v21  ;;  %v2581_v27 = vpack.c.bf16 %v2528_v25, %v2526_v24  ;;  %v2552_v28 = vrot.slane %v2512_v55, 3  ;;  %v2553_v29 = vrot.slane %v4671_v62, 3 }
 0x4ab   : > { %2995 = vmatprep.mubr.bf16.mxu1 %v2578_v22  ;;  %3419 = vmatmul.mubr.msk.bf16.vlgmr.msra.gmra.mrb[40].mxu0 %vm4492_vm7, %v3418_v6  ;;  %v2555_v31 = vrot.slane %v2514_v63, 3  ;;  %v3422_v32 = vpack.c.bf16 %v4671_v62, %v4664_v51  ;;  %v2538_v33 = vrot.slane %v2512_v55, 2  ;;  %v2539_v34 = vrot.slane %v4671_v62, 2  ;;  %v4126_v55 = vld [vmem:[#allocation5 + $0x630] sm:$0xff]  }
 0x4ac   : > { %2996 = vmatmul.mubr.bf16.vlgmr.msra.gmra.mrb[40].mxu1 %v2577_v26  ;;  %3845 = vmatpush3.bf16.msra.mxu0 %v4658_v30  ;;  %v2554_v35 = vsel %vm267_vm2, %v2552_v28, %v2553_v29  ;;  %v2541_v36 = vrot.slane %v2514_v63, 2  ;;  %v2561_v37 = vrot.slane %v2511_v58, 4  ;;  %v2562_v38 = vrot.slane %v2501_v3, 4  ;;  %v3375_v58 = vld [vmem:[%s4760_s2 + $0x4] ss:$0 sm:$0xff] }
 0x4ad   : > { %2954 = vmatprep.mubr.bf16.mxu0 %v2581_v27  ;;  %v2556_v39 = vsel %vm267_vm2, %v2553_v29, %v2555_v31  ;;  %3846 = vmatprep.subr.bf16.mxu0 %v4121_v10  ;;  %v2540_v41 = vsel %vm252_vm3, %v2538_v33, %v2539_v34  ;;  %v2564_v42 = vrot.slane %v2513_v4, 4  ;;  %v2568_v43 = vsel %vm282_vm5, %v2566_v57, %v2567_v1 }
 0x4ae   : > { %v2583_v44 = vpack.c.bf16 %v2556_v39, %v2554_v35  ;;  %v2542_v45 = vsel %vm252_vm3, %v2539_v34, %v2541_v36  ;;  %v2563_v30 = vsel %vm282_vm5, %v2561_v37, %v2562_v38  ;;  %v2570_v46 = vsel %vm282_vm5, %v2567_v1, %v2569_v2 }
 0x4af   : > { %v2582_v47 = vpack.c.bf16 %v2542_v45, %v2540_v41  ;;  %v2565_v48 = vsel %vm282_vm5, %v2562_v38, %v2564_v42  ;;  %v2584_v49 = vpack.c.bf16 %v2570_v46, %v2568_v43 }
 0x4b0   : > { %3003 = vmatprep.mubr.bf16.mxu1 %v2583_v44  ;;  %3847 = vmatpush3.bf16.msra.mxu0 %v4121_v10  ;;  %v2579_v51 = vpack.c.bf16 %v2565_v48, %v2563_v30 }
 0x4b1   : > { %3848 = vmatprep.subr.bf16.mxu0 %v4122_v40 }
 0x4b3   : > { %3423 = vmatmul.mubr.msk.bf16.gmra.mrb[44].mxu0 %vm4492_vm7, %v3422_v32 }
 0x4b4   : > { %3004 = vmatmul.mubr.bf16.gmra.mrb[44].mxu1 %v2582_v47  ;;  %3849 = vmatpush3.bf16.msra.mxu0 %v4122_v40 }
 0x4b5   : > { %3860 = vmatprep.mubr.bf16.mxu0 %v2579_v51  ;;  %3850 = vmatprep.subr.bf16.mxu0 %v4123_v52 }
 0x4b8   : > { %3851 = vmatpush3.bf16.msra.mxu0 %v4123_v52 }
 0x4b9   : > { %3852 = vmatprep.subr.bf16.mxu0 %v4124_v53 }
 0x4bc   : > { %3853 = vmatpush3.bf16.msra.mxu0 %v4124_v53 }
 0x4bd   : > { %3854 = vmatprep.subr.bf16.mxu0 %v4125_v54 }
 0x4c0   : > { %3855 = vmatpush3.bf16.msra.mxu0 %v4125_v54 }
 0x4c1   : > { %3856 = vmatprep.subr.bf16.mxu0 %v4126_v55 }
 0x4c4   : > { %3857 = vmatpush3.bf16.msra.mxu0 %v4126_v55 }
 0x4c5   : > { %3858 = vmatprep.subr.bf16.mxu0 %v4127_v56 }
 0x4c8   : > { %3859 = vmatpush3.bf16.msra.mxu0 %v4127_v56 }
 0x4cb   : > { %3861 = vmatmul.mubr.bf16.vlgmr.msra.gmra.mrb[48].mxu0 %v2584_v49 }
 0x57e   : > { %v3714_v50 = vpop.f32.mrb[40].mxu0 }
 0x57f   : > { %v3742_v57 = vpop.f32.mrb[40].mxu1  ;;  %v3715_v59 = vpop.f32.mrb[41].mxu0 }
 0x580   : > { %v3716_v60 = vadd.f32 %v3715_v59, %v3714_v50  ;;  %v3743_v61 = vpop.f32.mrb[41].mxu1  ;;  %v3717_v62 = vpop.f32.mrb[42].mxu0 }
 0x581   : > { %v3744_v63 = vadd.f32 %v3743_v61, %v3742_v57  ;;  %v3745_v0 = vpop.f32.mrb[42].mxu1  ;;  %v3718_v1 = vpop.f32.mrb[43].mxu0 }
 0x582   : > { %v2949_v2 = vadd.f32 %v3716_v60, %v3375_v58  ;;  %v3719_v3 = vadd.f32 %v3718_v1, %v3717_v62  ;;  %v3746_v4 = vpop.f32.mrb[43].mxu1 }
 0x583   : > { %v3747_v5 = vadd.f32 %v3746_v4, %v3745_v0 }
 0x584   : > { %v2952_v6 = vadd.f32 %v3719_v3, %v3375_v58  ;;  %v2998_v7 = vadd.f32 %v3744_v63, %v2949_v2 }
 0x586   : > { %v3720_v8 = vpop.f32.mrb[44].mxu0  ;;  %v3001_v9 = vadd.f32 %v3747_v5, %v2952_v6 }
 0x587   : > { %v3748_v11 = vpop.f32.mrb[44].mxu1  ;;  %v3721_v12 = vpop.f32.mrb[45].mxu0 }
 0x588   : > { %v3722_v13 = vadd.f32 %v3721_v12, %v3720_v8  ;;  %v3749_v14 = vpop.f32.mrb[45].mxu1  ;;  %v3723_v15 = vpop.f32.mrb[46].mxu0 }
 0x589   : > { %v3750_v16 = vadd.f32 %v3749_v14, %v3748_v11  ;;  %v3751_v17 = vpop.f32.mrb[46].mxu1  ;;  %v3724_v18 = vpop.f32.mrb[47].mxu0 }
 0x58a   : > { %v2957_v19 = vadd.f32 %v3722_v13, %v3375_v58  ;;  %v3725_v20 = vadd.f32 %v3724_v18, %v3723_v15  ;;  %v3752_v21 = vpop.f32.mrb[47].mxu1 }
 0x58b   : > { %v3753_v22 = vadd.f32 %v3752_v21, %v3751_v17 }
 0x58c   : > { %v2960_v23 = vadd.f32 %v3725_v20, %v3375_v58  ;;  %v3006_v24 = vadd.f32 %v3750_v16, %v2957_v19 }
 0x58e   : > { %v3009_v25 = vadd.f32 %v3753_v22, %v2960_v23 }
 0x59e   : > { %v3862_v10 = vpop.f32.mrb[48].mxu0 }
 0x59f   : > { %v3055_v26 = vadd.f32 %v3862_v10, %v3006_v24  ;;  %v3046_v27 = vpop.f32.mrb[49].mxu0 }
 0x5a0   : > { %v3047_v28 = vadd.f32 %v3046_v27, %v2998_v7  ;;  %v3863_v29 = vpop.f32.mrb[50].mxu0 }
 0x5a1   : > { %3063 = vst [vmem:[%s204_s29 + $0x10] sm:$0xff] %v3055_v26  ;;  %v3058_v31 = vadd.f32 %v3863_v29, %v3009_v25  ;;  %v3049_v32 = vpop.f32.mrb[51].mxu0 }
 0x5a2   : > { %3061 = vst [vmem:[%s204_s29] sm:$0xff] %v3047_v28  ;;  %v3050_v33 = vadd.f32 %v3049_v32, %v3001_v9 }
 0x5a3   : > { %3064 = vst [vmem:[%s204_s29 + $0x18] sm:$0xff] %v3058_v31 }
 0x5a4   : > { %3062 = vst [vmem:[%s204_s29 + $0x8] sm:$0xff] %v3050_v33 }
 0x5a5   : > { %4231 = shalt.err (!%p4228_p7)
}
 0x5a6   : > { %s4232_s25 = scalar_lea.hbm %s4714_s7, 512  ;;  %s4236_s10 = scalar_lea.hbm %s4761_s3, 1024 }
 0x5a7   : > { %p4233_p9 = scmp.ne.s32.totalorder %s4714_s7, %s4232_s25  ;;  %p4237_p5 = scmp.lt.u32.totalorder %s4714_s7, %s4761_s3 }
 0x5a8   : > { %p4238_p11 = scmp.lt.u32.totalorder %s4236_s10, %s4232_s25  ;;  %p4240_p4 = scmp.lt.u32.totalorder %s4232_s25, %s4714_s7 }
 0x5a9   : > { %p4234_p2 = pnand %p4233_p9, %p4411_p12 }
 0x5aa   : > { %p4239_p1 = por %p4238_p11, %p4237_p5 }
 0x5ab   : > { %p4235_p0 = pneg %p4234_p2 }
 0x5ac   : > { %p4241_p6 = por %p4240_p4, %p4239_p1 }
 0x5ae   : > { %p4242_p8 = pnand %p4241_p6, %p4235_p0 }
 0x5b0   : > { %4245 = shalt.err (!%p4242_p8)
}
 0x5b1   : > { %s4298_s28 = smov 128   ;;  %s4299_s29 = smov 8  }
 0x5b2   : > { %3870 = dma.vmem_to_hbm [thread:$0]  (%p4411_p12), %s4709_s23, 512, %s4714_s7, %s3066_s16, %s4298_s28, %s4298_s28, %s4299_s29  }
 0x5b3 PF: > { %s3095_s30 = sand.u32 1, %s4276_s12   ;;  %p4778_p10 = scmp.ne.s32.totalorder %s4766_s19, 0 }
 0x5b4   : > { %p4779_p13 = scmp.ge.s32.totalorder %s4288_s15, 2  ;;  %s3096_s22 = scalar_lea.sflag [#allocation4], %s3095_s30 }
 0x5b6   : > { %p3881_p3 = pnand %p4779_p13, %p4778_p10 }
 0x5b8   : > { %4271 = dma.done.wait (!%p3881_p3), %s3096_s22, 512  }
 0x5b9   : > { %4273 = vsyncadd (!%p3881_p3), %s3096_s22, 4294966784  ;;  %p17_p7 = scmp.ge.s32.totalorder %s4376_s24, 4   ;;  %s4780_s12 = smov %s4280_s13 }
 0x5ba   : > { %s4781_s13 = smov %s4284_s14  ;;  %s4782_s14 = smov %s4407_s17 }
 0x5bb   : > { %s4783_s15 = smov %s4376_s24  ;;  %19 = sbr.rel (!%p17_p7) target bundleno = 6 (0x6), region = 89 }
 0x5c2   :  { %3101 = vsyncpa [#allocation3], 1 }
 0x5c3   :  { %3103 = vsyncpa [#allocation3 + $0x1], 1 }
 0x5c4   :  { %3104 = vsyncpa [#allocation6], 1 }
 0x5c5   :  { %3105 = vsyncpa [#allocation4], 1 }
 0x5c6   :  { %3107 = vsyncpa [#allocation4 + $0x1], 1 }

</bundles_post_ra>
